<compile_context>
chip_gen: v6e
topology: v6e:2x2x1
jax: 0.10.0
libtpu: 0.0.40
codegen_flags: <defaults>
</compile_context>

<pallas_src>
import jax
import jax.numpy as jnp
import numpy as np
from jax.experimental import pallas as pl
from jax.experimental.pallas import tpu as pltpu

BN_EPS = 1e-5
# Layer widths of the original module; input_size kept small (16*16) for the demo.
# (The kernel generalizes to the original 224*224 input unchanged.)
DIMS = [16 * 16, 1024, 512, 256, 128, 64, 1]
NUM_BN_LAYERS = 5          # first 5 Linear layers are followed by ReLU + BatchNorm1d + Dropout
NUM_LINEAR = len(DIMS) - 1
OUT_PAD = 128              # final layer padded from 1 -> 128 lanes (lane-dense output)

# Per-linear output widths as seen by the kernel: layer 4 padded 64 -> 128 and layer 5
# padded 1 -> 128, so every matmul output / activation is lane-dense.
LAYER_WIDTHS = (1024, 512, 256, 128, 128, 128)
_BIAS_PADDED = (1024, 512, 256, 128, 128, 128)
BIAS_OFFSETS = tuple(int(o) for o in np.cumsum((0,) + _BIAS_PADDED)[:NUM_LINEAR])
BIAS_TOTAL = int(sum(_BIAS_PADDED))     # 2176


def mlp_kernel(x_ref, w0_ref, w1_ref, w2_ref, w3_ref, w4_ref, w5_ref, b_ref, out_ref):
    """Fused MLP forward on one batch tile.

    x_ref  : [TM, 256]  bf16 batch tile
    w*_ref : bf16 weights, pre-transposed to [in, out]; BN folded in, layers 4/5 padded
             to 128 lanes. Resident in VMEM across the grid (constant index_map).
    b_ref  : [1, BIAS_TOTAL] f32 packed biases (128-aligned segments).
    out_ref: [TM, 128] bf16 (column 0 is the real sigmoid output).
    """
    w_refs = (w0_ref, w1_ref, w2_ref, w3_ref, w4_ref, w5_ref)
    h = x_ref[...]                                              # bf16 [TM, 256]
    for li in range(NUM_BN_LAYERS):
        n, off = LAYER_WIDTHS[li], BIAS_OFFSETS[li]
        acc = jnp.dot(h, w_refs[li][...], preferred_element_type=jnp.float32)
        acc = acc + b_ref[:, off:off + n]                       # f32 bias add (broadcast)
        # ReLU; BatchNorm1d (eval) is folded into the next layer's W/b; Dropout(0.3) = identity.
        h = jnp.maximum(acc, 0.0).astype(jnp.bfloat16)
    n, off = LAYER_WIDTHS[-1], BIAS_OFFSETS[-1]
    logits = jnp.dot(h, w_refs[-1][...], preferred_element_type=jnp.float32)
    logits = logits + b_ref[:, off:off + n]
    out_ref[...] = jax.nn.sigmoid(logits).astype(out_ref.dtype)


def init_params(key):
    """Deterministic synthetic parameters matching the module's shapes (unfolded)."""
    flat = []
    keys = jax.random.split(key, NUM_LINEAR * 6)
    k = 0
    for li in range(NUM_LINEAR):
        fan_in, fan_out = DIMS[li], DIMS[li + 1]
        bound = 1.0 / np.sqrt(fan_in)
        # PyTorch Linear weight is [out, in]; we keep it pre-transposed as [in, out].
        w = jax.random.uniform(keys[k], (fan_in, fan_out), jnp.float32, -bound, bound); k += 1
        b = jax.random.uniform(keys[k], (1, fan_out), jnp.float32, -bound, bound); k += 1
        flat += [w, b]
        if li < NUM_BN_LAYERS:
            gamma = jax.random.uniform(keys[k], (1, fan_out), jnp.float32, 0.5, 1.5); k += 1
            beta = jax.random.uniform(keys[k], (1, fan_out), jnp.float32, -0.5, 0.5); k += 1
            r_mean = jax.random.uniform(keys[k], (1, fan_out), jnp.float32, -0.5, 0.5); k += 1
            r_var = jax.random.uniform(keys[k], (1, fan_out), jnp.float32, 0.5, 1.5); k += 1
            flat += [gamma, beta, r_mean, r_var]
        else:
            k += 4  # keep key consumption aligned (unused)
    return flat


def fold_and_pack_params(flat_params):
    """One-time offline param prep (all folding done in f32, cast to bf16 at the end):
       * fold eval-mode BN_i (scale s, shift t) into Linear_{i+1}: W' = diag(s)@W, b' = t@W + b
       * pad layer 4 output 64 -> 128 and layer 5 (1-wide head) to 128x128 (lane-dense)
       * cast weights to bf16; pack all biases (f32) into one [1, BIAS_TOTAL] array
         at 128-aligned offsets.
    """
    Ws, bs, bns = [], [], []
    idx = 0
    for li in range(NUM_LINEAR):
        Ws.append(flat_params[idx]); bs.append(flat_params[idx + 1]); idx += 2
        if li < NUM_BN_LAYERS:
            bns.append(tuple(flat_params[idx:idx + 4])); idx += 4

    folded_W = [Ws[0]]
    folded_b = [bs[0]]
    for i in range(NUM_BN_LAYERS):
        gamma, beta, mean, var = bns[i]
        s = gamma * jax.lax.rsqrt(var + BN_EPS)        # [1, n_i]
        t = beta - mean * s                            # [1, n_i]
        folded_W.append(Ws[i + 1] * s.reshape(-1, 1))  # scale rows of the next weight
        folded_b.append(t @ Ws[i + 1] + bs[i + 1])

    def pad_to(a, rows, cols):
        return jnp.zeros((rows, cols), jnp.float32).at[:a.shape[0], :a.shape[1]].set(a)

    # Layer 4: output 64 -> 128 lanes. New lanes get zero weight columns and zero bias,
    # so ReLU leaves them exactly 0 (numerics unchanged).
    folded_W[4] = pad_to(folded_W[4], folded_W[4].shape[0], LAYER_WIDTHS[4])
    folded_b[4] = pad_to(folded_b[4], 1, LAYER_WIDTHS[4])
    # Layer 5: input 64 -> 128 rows (zeros), output 1 -> 128 lanes (zeros).
    folded_W[5] = pad_to(folded_W[5], LAYER_WIDTHS[4], LAYER_WIDTHS[5])
    folded_b[5] = pad_to(folded_b[5], 1, LAYER_WIDTHS[5])

    weights_bf16 = [w.astype(jnp.bfloat16) for w in folded_W]

    segs = [jnp.pad(b, ((0, 0), (0, wpad - b.shape[1])))
            for b, wpad in zip(folded_b, _BIAS_PADDED)]
    bias_packed = jnp.concatenate(segs, axis=1).astype(jnp.float32)   # [1, BIAS_TOTAL]
    return weights_bf16, bias_packed


def _round_up(x, m):
    return ((x + m - 1) // m) * m


def _default_block_batch():
    """512 on v5e (16 MiB scoped-VMEM default / 197 TF/s), 1024 on v6e/v7x."""
    try:
        kind = jax.devices()[0].device_kind.lower()
    except Exception:
        return 512
    return 512 if "v5" in kind else 1024


def _resident_spec(shape):
    """Constant-index (VMEM-resident) operand: single-buffer it when supported
    (its second pipeline buffer is never used), else fall back to the default."""
    index_map = lambda i: (0, 0)
    try:
        return pl.BlockSpec(shape, index_map, pipeline_mode=pl.Buffered(1))
    except (TypeError, AttributeError):
        return pl.BlockSpec(shape, index_map)


def binary_classifier_forward(x, weights_bf16, bias_packed, *, block_batch=None):
    """x: [B, C, H, W] (NCHW, like PyTorch) with C*H*W == DIMS[0]. Returns [B, 1] f32."""
    B = x.shape[0]
    in_features = DIMS[0]
    x2d = x.reshape(B, -1).astype(jnp.bfloat16)        # nn.Flatten() + bf16 for MXU
    assert x2d.shape[1] == in_features

    if block_batch is None:
        block_batch = _default_block_batch()

    # Batch tile selection:
    #  - large B: one big tile (amortizes ~0.35 us/step overhead)
    #  - 16 <= B <= block_batch: split into >= 2 tiles so v7x's two TensorCores both work
    #  - tiny B: a single >=8-row tile
    if B > block_batch:
        TM = block_batch
    elif B >= 16:
        TM = _round_up(pl.cdiv(B, 2), 8)
    else:
        TM = max(8, _round_up(B, 8))
    B_pad = pl.cdiv(B, TM) * TM
    if B_pad != B:
        x2d = jnp.pad(x2d, ((0, B_pad - B), (0, 0)))

    grid = (B_pad // TM,)
    in_specs = (
        [pl.BlockSpec((TM, in_features), lambda i: (i, 0))]          # double-buffered x
        + [_resident_spec(w.shape) for w in weights_bf16]            # resident weights
        + [_resident_spec(bias_packed.shape)]                        # resident packed biases
    )

    out = pl.pallas_call(
        mlp_kernel,
        out_shape=jax.ShapeDtypeStruct((B_pad, OUT_PAD), jnp.bfloat16),
        grid=grid,
        in_specs=in_specs,
        out_specs=pl.BlockSpec((TM, OUT_PAD), lambda i: (i, 0)),
        compiler_params=pltpu.CompilerParams(
            dimension_semantics=("parallel",),      # shard batch tiles across v7x TCs
            vmem_limit_bytes=32 * 1024 * 1024,      # headroom for TM up to 1024 (safe on all gens)
        ),
    )(x2d, *weights_bf16, bias_packed)

    # Column 0 / rows [:B] are the real outputs; padded lanes/rows are garbage by design.
    return out[:B, :1].astype(jnp.float32)


def reference_forward(x, flat_params):
    """Plain-JAX f32 reference with original (unfolded) eval-mode semantics."""
    B = x.shape[0]
    h = x.reshape(B, -1).astype(jnp.float32)
    idx = 0
    for _ in range(NUM_BN_LAYERS):
        w, b, g, beta, mean, var = flat_params[idx:idx + 6]
        idx += 6
        h = jnp.maximum(h @ w + b, 0.0)
        h = (h - mean) / jnp.sqrt(var + BN_EPS) * g + beta
    w, b = flat_params[idx], flat_params[idx + 1]
    return jax.nn.sigmoid(h @ w + b)


if __name__ == "__main__":
    key = jax.random.PRNGKey(0)
    k_param, k_x = jax.random.split(key)

    raw_params = init_params(k_param)
    weights_bf16, bias_packed = fold_and_pack_params(raw_params)

    # Small NCHW input: batch=24, channels=1, spatial=16x16 -> flatten to 256 features.
    # B=24 exercises the >=2-tile path (TM=16, grid=(2,)) and batch padding (24 -> 32).
    B = 24
    x = jax.random.normal(k_x, (B, 1, 16, 16), dtype=jnp.float32)

    out = binary_classifier_forward(x, weights_bf16, bias_packed)
    out = jax.block_until_ready(out)

    ref = reference_forward(x, raw_params)
    out_np, ref_np = np.asarray(out), np.asarray(ref)
    assert out_np.shape == (B, 1)
    # bf16 matmul inputs / bf16 output (f32 accumulation) vs. pure-f32 reference:
    # allow small abs error on the post-sigmoid outputs.
    if not np.allclose(out_np, ref_np, rtol=0.0, atol=2e-2):
        raise AssertionError(
            f"Pallas kernel output does not match reference "
            f"(max abs err = {np.max(np.abs(out_np - ref_np)):.3e})")

    print("KERNEL_OK")
</pallas_src>

<mosaic_0001>
module attributes {stable_mosaic.version = 11 : i64} {
  func.func @mlp_kernel(%arg0: i32, %arg1: memref<16x256xbf16, #tpu.memory_space<vmem>>, %arg2: memref<256x1024xbf16, #tpu.memory_space<vmem>>, %arg3: memref<1024x512xbf16, #tpu.memory_space<vmem>>, %arg4: memref<512x256xbf16, #tpu.memory_space<vmem>>, %arg5: memref<256x128xbf16, #tpu.memory_space<vmem>>, %arg6: memref<128x128xbf16, #tpu.memory_space<vmem>>, %arg7: memref<128x128xbf16, #tpu.memory_space<vmem>>, %arg8: memref<1x2176xf32, #tpu.memory_space<vmem>>, %arg9: memref<16x128xbf16, #tpu.memory_space<vmem>>) attributes {dimension_semantics = [#tpu.dimension_semantics<parallel>], iteration_bounds = array<i64: 2>, scalar_prefetch = 0 : i64, scratch_operands = 0 : i64, tpu.core_type = #tpu.core_type<tc>, window_params = [{transform_indices = @transform_0, window_bounds = array<i64: 16, 256>}, {pipeline_mode = #tpu.pipeline_mode<synchronous>, transform_indices = @transform_1, window_bounds = array<i64: 256, 1024>}, {pipeline_mode = #tpu.pipeline_mode<synchronous>, transform_indices = @transform_2, window_bounds = array<i64: 1024, 512>}, {pipeline_mode = #tpu.pipeline_mode<synchronous>, transform_indices = @transform_3, window_bounds = array<i64: 512, 256>}, {pipeline_mode = #tpu.pipeline_mode<synchronous>, transform_indices = @transform_4, window_bounds = array<i64: 256, 128>}, {pipeline_mode = #tpu.pipeline_mode<synchronous>, transform_indices = @transform_5, window_bounds = array<i64: 128, 128>}, {pipeline_mode = #tpu.pipeline_mode<synchronous>, transform_indices = @transform_6, window_bounds = array<i64: 128, 128>}, {pipeline_mode = #tpu.pipeline_mode<synchronous>, transform_indices = @transform_7, window_bounds = array<i64: 1, 2176>}, {transform_indices = @transform_8, window_bounds = array<i64: 16, 128>}]} {
    %c0 = arith.constant 0 : index
    %c0_0 = arith.constant 0 : index
    %0 = vector.load %arg1[%c0, %c0_0] : memref<16x256xbf16, #tpu.memory_space<vmem>>, vector<16x256xbf16>
    %c0_1 = arith.constant 0 : index
    %c0_2 = arith.constant 0 : index
    %1 = vector.load %arg2[%c0_1, %c0_2] : memref<256x1024xbf16, #tpu.memory_space<vmem>>, vector<256x1024xbf16>
    %cst = arith.constant dense<0.000000e+00> : vector<16x1024xf32>
    %2 = tpu.matmul %0, %1, %cst {dimension_numbers = #tpu.dot_dimension_numbers<[1], [0], [0], [1], [0, 0, 1, 1], [], []>} : vector<16x256xbf16>, vector<256x1024xbf16>, vector<16x1024xf32> -> vector<16x1024xf32>
    %c0_3 = arith.constant 0 : index
    %c0_4 = arith.constant 0 : index
    %3 = vector.load %arg8[%c0_3, %c0_4] : memref<1x2176xf32, #tpu.memory_space<vmem>>, vector<1x1024xf32>
    %4 = vector.broadcast %3 : vector<1x1024xf32> to vector<16x1024xf32>
    %5 = arith.addf %2, %4 : vector<16x1024xf32>
    %cst_5 = arith.constant 0.000000e+00 : f32
    %6 = vector.broadcast %cst_5 : f32 to vector<16x1024xf32>
    %7 = arith.maximumf %5, %6 : vector<16x1024xf32>
    %8 = arith.truncf %7 : vector<16x1024xf32> to vector<16x1024xbf16>
    %c0_6 = arith.constant 0 : index
    %c0_7 = arith.constant 0 : index
    %9 = vector.load %arg3[%c0_6, %c0_7] : memref<1024x512xbf16, #tpu.memory_space<vmem>>, vector<1024x512xbf16>
    %cst_8 = arith.constant dense<0.000000e+00> : vector<16x512xf32>
    %10 = tpu.matmul %8, %9, %cst_8 {dimension_numbers = #tpu.dot_dimension_numbers<[1], [0], [0], [1], [0, 0, 1, 1], [], []>} : vector<16x1024xbf16>, vector<1024x512xbf16>, vector<16x512xf32> -> vector<16x512xf32>
    %c0_9 = arith.constant 0 : index
    %c1024 = arith.constant 1024 : index
    %11 = vector.load %arg8[%c0_9, %c1024] : memref<1x2176xf32, #tpu.memory_space<vmem>>, vector<1x512xf32>
    %12 = vector.broadcast %11 : vector<1x512xf32> to vector<16x512xf32>
    %13 = arith.addf %10, %12 : vector<16x512xf32>
    %cst_10 = arith.constant 0.000000e+00 : f32
    %14 = vector.broadcast %cst_10 : f32 to vector<16x512xf32>
    %15 = arith.maximumf %13, %14 : vector<16x512xf32>
    %16 = arith.truncf %15 : vector<16x512xf32> to vector<16x512xbf16>
    %c0_11 = arith.constant 0 : index
    %c0_12 = arith.constant 0 : index
    %17 = vector.load %arg4[%c0_11, %c0_12] : memref<512x256xbf16, #tpu.memory_space<vmem>>, vector<512x256xbf16>
    %cst_13 = arith.constant dense<0.000000e+00> : vector<16x256xf32>
    %18 = tpu.matmul %16, %17, %cst_13 {dimension_numbers = #tpu.dot_dimension_numbers<[1], [0], [0], [1], [0, 0, 1, 1], [], []>} : vector<16x512xbf16>, vector<512x256xbf16>, vector<16x256xf32> -> vector<16x256xf32>
    %c0_14 = arith.constant 0 : index
    %c1536 = arith.constant 1536 : index
    %19 = vector.load %arg8[%c0_14, %c1536] : memref<1x2176xf32, #tpu.memory_space<vmem>>, vector<1x256xf32>
    %20 = vector.broadcast %19 : vector<1x256xf32> to vector<16x256xf32>
    %21 = arith.addf %18, %20 : vector<16x256xf32>
    %cst_15 = arith.constant 0.000000e+00 : f32
    %22 = vector.broadcast %cst_15 : f32 to vector<16x256xf32>
    %23 = arith.maximumf %21, %22 : vector<16x256xf32>
    %24 = arith.truncf %23 : vector<16x256xf32> to vector<16x256xbf16>
    %c0_16 = arith.constant 0 : index
    %c0_17 = arith.constant 0 : index
    %25 = vector.load %arg5[%c0_16, %c0_17] : memref<256x128xbf16, #tpu.memory_space<vmem>>, vector<256x128xbf16>
    %cst_18 = arith.constant dense<0.000000e+00> : vector<16x128xf32>
    %26 = tpu.matmul %24, %25, %cst_18 {dimension_numbers = #tpu.dot_dimension_numbers<[1], [0], [0], [1], [0, 0, 1, 1], [], []>} : vector<16x256xbf16>, vector<256x128xbf16>, vector<16x128xf32> -> vector<16x128xf32>
    %c0_19 = arith.constant 0 : index
    %c1792 = arith.constant 1792 : index
    %27 = vector.load %arg8[%c0_19, %c1792] : memref<1x2176xf32, #tpu.memory_space<vmem>>, vector<1x128xf32>
    %28 = vector.broadcast %27 : vector<1x128xf32> to vector<16x128xf32>
    %29 = arith.addf %26, %28 : vector<16x128xf32>
    %cst_20 = arith.constant 0.000000e+00 : f32
    %30 = vector.broadcast %cst_20 : f32 to vector<16x128xf32>
    %31 = arith.maximumf %29, %30 : vector<16x128xf32>
    %32 = arith.truncf %31 : vector<16x128xf32> to vector<16x128xbf16>
    %c0_21 = arith.constant 0 : index
    %c0_22 = arith.constant 0 : index
    %33 = vector.load %arg6[%c0_21, %c0_22] : memref<128x128xbf16, #tpu.memory_space<vmem>>, vector<128x128xbf16>
    %cst_23 = arith.constant dense<0.000000e+00> : vector<16x128xf32>
    %34 = tpu.matmul %32, %33, %cst_23 {dimension_numbers = #tpu.dot_dimension_numbers<[1], [0], [0], [1], [0, 0, 1, 1], [], []>} : vector<16x128xbf16>, vector<128x128xbf16>, vector<16x128xf32> -> vector<16x128xf32>
    %c0_24 = arith.constant 0 : index
    %c1920 = arith.constant 1920 : index
    %35 = vector.load %arg8[%c0_24, %c1920] : memref<1x2176xf32, #tpu.memory_space<vmem>>, vector<1x128xf32>
    %36 = vector.broadcast %35 : vector<1x128xf32> to vector<16x128xf32>
    %37 = arith.addf %34, %36 : vector<16x128xf32>
    %cst_25 = arith.constant 0.000000e+00 : f32
    %38 = vector.broadcast %cst_25 : f32 to vector<16x128xf32>
    %39 = arith.maximumf %37, %38 : vector<16x128xf32>
    %40 = arith.truncf %39 : vector<16x128xf32> to vector<16x128xbf16>
    %c0_26 = arith.constant 0 : index
    %c0_27 = arith.constant 0 : index
    %41 = vector.load %arg7[%c0_26, %c0_27] : memref<128x128xbf16, #tpu.memory_space<vmem>>, vector<128x128xbf16>
    %cst_28 = arith.constant dense<0.000000e+00> : vector<16x128xf32>
    %42 = tpu.matmul %40, %41, %cst_28 {dimension_numbers = #tpu.dot_dimension_numbers<[1], [0], [0], [1], [0, 0, 1, 1], [], []>} : vector<16x128xbf16>, vector<128x128xbf16>, vector<16x128xf32> -> vector<16x128xf32>
    %c0_29 = arith.constant 0 : index
    %c2048 = arith.constant 2048 : index
    %43 = vector.load %arg8[%c0_29, %c2048] : memref<1x2176xf32, #tpu.memory_space<vmem>>, vector<1x128xf32>
    %44 = vector.broadcast %43 : vector<1x128xf32> to vector<16x128xf32>
    %45 = arith.addf %42, %44 : vector<16x128xf32>
    %46 = arith.negf %45 : vector<16x128xf32>
    %47 = math.exp %46 : vector<16x128xf32>
    %cst_30 = arith.constant 1.000000e+00 : f32
    %48 = vector.broadcast %cst_30 : f32 to vector<16x128xf32>
    %49 = arith.addf %48, %47 : vector<16x128xf32>
    %50 = arith.divf %48, %49 : vector<16x128xf32>
    %51 = arith.truncf %50 : vector<16x128xf32> to vector<16x128xbf16>
    %c0_31 = arith.constant 0 : index
    %c0_32 = arith.constant 0 : index
    %52 = vector.load %arg9[%c0_31, %c0_32] : memref<16x128xbf16, #tpu.memory_space<vmem>>, vector<16x128xbf16>
    tpu.vector_store %arg9[%c0_31, %c0_32], %51 {strides = array<i32>} : memref<16x128xbf16, #tpu.memory_space<vmem>>, vector<16x128xbf16>,
    return
  }
  func.func @transform_0(%arg0: i32) -> (i32, i32) {
    %c0_i32 = arith.constant 0 : i32
    %c0_i32_0 = arith.constant 0 : i32
    return %arg0, %c0_i32 : i32, i32
  }
  func.func @transform_1(%arg0: i32) -> (i32, i32) {
    %c0_i32 = arith.constant 0 : i32
    %c0_i32_0 = arith.constant 0 : i32
    %c0_i32_1 = arith.constant 0 : i32
    return %c0_i32, %c0_i32_0 : i32, i32
  }
  func.func @transform_2(%arg0: i32) -> (i32, i32) {
    %c0_i32 = arith.constant 0 : i32
    %c0_i32_0 = arith.constant 0 : i32
    %c0_i32_1 = arith.constant 0 : i32
    return %c0_i32, %c0_i32_0 : i32, i32
  }
  func.func @transform_3(%arg0: i32) -> (i32, i32) {
    %c0_i32 = arith.constant 0 : i32
    %c0_i32_0 = arith.constant 0 : i32
    %c0_i32_1 = arith.constant 0 : i32
    return %c0_i32, %c0_i32_0 : i32, i32
  }
  func.func @transform_4(%arg0: i32) -> (i32, i32) {
    %c0_i32 = arith.constant 0 : i32
    %c0_i32_0 = arith.constant 0 : i32
    %c0_i32_1 = arith.constant 0 : i32
    return %c0_i32, %c0_i32_0 : i32, i32
  }
  func.func @transform_5(%arg0: i32) -> (i32, i32) {
    %c0_i32 = arith.constant 0 : i32
    %c0_i32_0 = arith.constant 0 : i32
    %c0_i32_1 = arith.constant 0 : i32
    return %c0_i32, %c0_i32_0 : i32, i32
  }
  func.func @transform_6(%arg0: i32) -> (i32, i32) {
    %c0_i32 = arith.constant 0 : i32
    %c0_i32_0 = arith.constant 0 : i32
    %c0_i32_1 = arith.constant 0 : i32
    return %c0_i32, %c0_i32_0 : i32, i32
  }
  func.func @transform_7(%arg0: i32) -> (i32, i32) {
    %c0_i32 = arith.constant 0 : i32
    %c0_i32_0 = arith.constant 0 : i32
    %c0_i32_1 = arith.constant 0 : i32
    return %c0_i32, %c0_i32_0 : i32, i32
  }
  func.func @transform_8(%arg0: i32) -> (i32, i32) {
    %c0_i32 = arith.constant 0 : i32
    %c0_i32_0 = arith.constant 0 : i32
    return %arg0, %c0_i32 : i32, i32
  }
}

</mosaic_0001>

<bundles_post_ra>
// kernel: tpu_custom_call.1
= control target key start
LH: loop header
LB: loop body
LE: loop exit
PB: predicated region body
PF: predicated region fallthrough
CT: control target
= control target key end

     0   :  { %s6409_s0 = inlined_call_operand.hbm [shape: bf16[32,256], index: 0, kind: input, shape index: {}]   ;;  %s6410_s1 = inlined_call_operand.hbm [shape: bf16[256,1024], index: 1, kind: input, shape index: {}]   ;;  %s6411_s2 = inlined_call_operand.hbm [shape: bf16[1024,512], index: 2, kind: input, shape index: {}]   ;;  %s6412_s3 = inlined_call_operand.hbm [shape: bf16[512,256], index: 3, kind: input, shape index: {}]   ;;  %s6413_s4 = inlined_call_operand.hbm [shape: bf16[256,128], index: 4, kind: input, shape index: {}]   ;;  %s6414_s5 = inlined_call_operand.hbm [shape: bf16[128,128], index: 5, kind: input, shape index: {}]   ;;  %s6415_s6 = inlined_call_operand.hbm [shape: bf16[128,128], index: 6, kind: input, shape index: {}]   ;;  %s6416_s7 = inlined_call_operand.hbm [shape: f32[1,2176], index: 7, kind: input, shape index: {}]   ;;  %s6417_s8 = inlined_call_operand.hbm [shape: bf16[32,128], index: 8, kind: output, shape index: {}]  }
   0x1   :  { %6424 = sst [smem:[#allocation23_spill]] %s6410_s1 }
   0x2   :  { %6425 = sst [smem:[#allocation24_spill]] %s6411_s2 }
   0x3   :  { %13 = vsyncpa [#allocation3], 0 }
   0x4   :  { %15 = vsyncpa [#allocation3 + $0x1], 0 }
   0x5   :  { %16 = vsyncpa [#allocation6], 0 }
   0x6   :  { %17 = vsyncpa [#allocation9], 0 }
   0x7   :  { %18 = vsyncpa [#allocation12], 0 }
   0x8   :  { %19 = vsyncpa [#allocation15], 0 }
   0x9   :  { %20 = vsyncpa [#allocation4], 0 }
   0xa   :  { %22 = vsyncpa [#allocation4 + $0x1], 0  ;;  %s6048_s27 = smov 0   ;;  %s6050_s28 = smov 0  }
   0xb   :  { %s6052_s29 = smov 0   ;;  %s6054_s30 = smov 0  }
   0xc LB: > { %s5982_s9 = smov [#allocation5]   ;;  %s6069_s11 = sadd.s32 4294967295, %s5980_s30   ;;  %s5980_s30 = sphi %s6054_s30, %s6454_s30   ;;  %s5976_s29 = sphi %s6052_s29, %s6453_s29   ;;  %s5972_s28 = sphi %s6050_s28, %s6452_s28   ;;  %s5968_s27 = sphi %s6048_s27, %s6451_s27  }
   0xd   : > { %s244_s10 = sshll.u32 %s5982_s9, 4  ;;  %p4431_p0 = scmp.ge.s32.totalorder %s5980_s30, 1  ;;  %s245_s10 = int_to_ptr.vmem [resolvable:$true] %s244_s10 }
   0xe   : > { %p6418_p1 = scmp.eq.s32.totalorder %s6069_s11, 0  ;;  %p232_p2 = scmp.lt.s32.totalorder %s5980_s30, 3 }
   0xf   : > { %s5983_s13 = smov [#allocation8]   ;;  %s5701_s17 = scalar_lea.vmem %s245_s10, 16384 }
  0x10   : > { %p6074_p3 = pnand %p4431_p0, %p232_p2  ;;  %s270_s14 = sshll.u32 %s5983_s13, 4  ;;  %s271_s14 = int_to_ptr.vmem [resolvable:$true] %s270_s14 }
  0x11   : > { %p5702_p8 = scmp.ne.s32.totalorder %s245_s10, %s5701_s17  ;;  %p5709_p11 = scmp.lt.s32.totalorder %s245_s10, %s245_s10 }
  0x12   : > { %s6426_s12 = scalar_select %p6074_p3, 1, 0 }
  0x13   : > { %p5070_p5 = pneg %p6074_p3  ;;  %p5710_p12 = scmp.lt.s32.totalorder %s5701_s17, %s5701_s17 }
  0x15   : > { %p6083_p6 = pnand %p5070_p5, %p6418_p1  ;;  %p5711_p13 = por %p5710_p12, %p5709_p11 }
  0x17   : > { %p6089_p7 = pneg %p6083_p6 }
  0x19   : > { %p5704_p9 = pnand %p5702_p8, %p6089_p7 }
  0x1b   : > { %p5705_p10 = pneg %p5704_p9 }
  0x1d   : > { %p5712_p0 = pnand %p5711_p13, %p5705_p10 }
  0x1f   : > { %5715 = shalt.err (!%p5712_p0)
}
  0x20   : > { %s5984_s18 = smov 512   ;;  %s5985_s19 = smov 32  }
  0x21   : > { %s6429_s1 = sld [smem:[#allocation23_spill]]  ;;  %s5727_s22 = scalar_lea.vmem %s271_s14, 8192 }
  0x22   : > { %p5728_p2 = scmp.ne.s32.totalorder %s271_s14, %s5727_s22  ;;  %p5735_p9 = scmp.lt.s32.totalorder %s271_s14, %s271_s14 }
  0x23   : > { %p5736_p4 = scmp.lt.s32.totalorder %s5727_s22, %s5727_s22 }
  0x24   : > { %p5730_p5 = pnand %p5728_p2, %p6089_p7 }
  0x25   : > { %p5737_p1 = por %p5736_p4, %p5735_p9 }
  0x26   : > { %p5731_p8 = pneg %p5730_p5 }
  0x27   : > { %5073 = dma.hbm_to_vmem [thread:$0]  (!%p6083_p6), %s6429_s1, 16384, %s245_s10, [#allocation6], %s5984_s18, %s5984_s18, %s5985_s19  }
  0x28   : > { %p5738_p11 = pnand %p5737_p1, %p5731_p8 }
  0x2a   : > { %5741 = shalt.err (!%p5738_p11)
}
  0x2b   : > { %s6419_s23 = smov 128   ;;  %s6420_s24 = smov 8  }
  0x2c   : > { %5079 = dma.hbm_to_vmem [thread:$0]  (!%p6083_p6), %s6412_s3, 8192, %s271_s14, [#allocation9], %s6419_s23, %s6419_s23, %s6420_s24  }
  0x2d   : > { %s5988_s9 = smov [#allocation11]   ;;  %s5989_s13 = smov [#allocation7]  }
  0x2e   : > { %s296_s10 = sshll.u32 %s5988_s9, 4  ;;  %s257_s17 = sshll.u32 %s5989_s13, 4  ;;  %s297_s10 = int_to_ptr.vmem [resolvable:$true] %s296_s10  ;;  %s258_s17 = int_to_ptr.vmem [resolvable:$true] %s257_s17 }
  0x2f   : > { %s5753_s18 = scalar_lea.vmem %s297_s10, 1024  ;;  %p5761_p12 = scmp.lt.s32.totalorder %s297_s10, %s297_s10 }
  0x30   : > { %p5754_p1 = scmp.ne.s32.totalorder %s297_s10, %s5753_s18  ;;  %p5762_p13 = scmp.lt.s32.totalorder %s5753_s18, %s5753_s18 }
  0x32   : > { %p5756_p4 = pnand %p5754_p1, %p6089_p7  ;;  %p5763_p0 = por %p5762_p13, %p5761_p12 }
  0x34   : > { %p5757_p10 = pneg %p5756_p4 }
  0x36   : > { %p5764_p2 = pnand %p5763_p0, %p5757_p10 }
  0x38   : > { %5767 = shalt.err (!%p5764_p2)
}
  0x39   : > { %s5990_s19 = smov 64   ;;  %s5991_s14 = smov 4  }
  0x3a   : > { %5085 = dma.hbm_to_vmem [thread:$0]  (!%p6083_p6), %s6414_s5, 1024, %s297_s10, [#allocation12], %s5990_s19, %s5990_s19, %s5991_s14  }
  0x3b   : > { %s5779_s22 = scalar_lea.vmem %s258_s17, 32768  ;;  %p5787_p11 = scmp.lt.s32.totalorder %s258_s17, %s258_s17 }
  0x3c   : > { %p5780_p5 = scmp.ne.s32.totalorder %s258_s17, %s5779_s22  ;;  %p5788_p1 = scmp.lt.s32.totalorder %s5779_s22, %s5779_s22 }
  0x3e   : > { %p5782_p8 = pnand %p5780_p5, %p6089_p7  ;;  %p5789_p4 = por %p5788_p1, %p5787_p11 }
  0x40   : > { %p5783_p9 = pneg %p5782_p8 }
  0x42   : > { %p5790_p10 = pnand %p5789_p4, %p5783_p9 }
  0x44   : > { %5793 = shalt.err (!%p5790_p10)
}
  0x45   : > { %s5992_s25 = smov 256   ;;  %s5993_s26 = smov 16  }
  0x46   : > { %s6430_s2 = sld [smem:[#allocation24_spill]]  ;;  %s5994_s10 = smov [#allocation10]  }
  0x47   : > { %s283_s18 = sshll.u32 %s5994_s10, 4  ;;  %s5995_s20 = smov [#allocation13]   ;;  %s284_s18 = int_to_ptr.vmem [resolvable:$true] %s283_s18 }
  0x48   : > { %s309_s21 = sshll.u32 %s5995_s20, 4  ;;  %s5805_s23 = scalar_lea.vmem %s284_s18, 2048  ;;  %s310_s21 = int_to_ptr.vmem [resolvable:$true] %s309_s21 }
  0x49   : > { %p5806_p12 = scmp.ne.s32.totalorder %s284_s18, %s5805_s23  ;;  %p5813_p2 = scmp.lt.s32.totalorder %s284_s18, %s284_s18 }
  0x4a   : > { %p5814_p5 = scmp.lt.s32.totalorder %s5805_s23, %s5805_s23 }
  0x4b   : > { %p5808_p13 = pnand %p5806_p12, %p6089_p7 }
  0x4c   : > { %5076 = dma.hbm_to_vmem [thread:$0]  (!%p6083_p6), %s6430_s2, 32768, %s258_s17, [#allocation6], %s5992_s25, %s5992_s25, %s5993_s26  }
  0x4d   : > { %p5809_p0 = pneg %p5808_p13  ;;  %p5815_p8 = por %p5814_p5, %p5813_p2 }
  0x4f   : > { %p5816_p9 = pnand %p5815_p8, %p5809_p0 }
  0x51   : > { %5819 = shalt.err (!%p5816_p9)
}
  0x52   : > { %5082 = dma.hbm_to_vmem [thread:$0]  (!%p6083_p6), %s6413_s4, 2048, %s284_s18, [#allocation9], %s5990_s19, %s5990_s19, %s5991_s14  }
  0x53   : > { %s5831_s25 = scalar_lea.vmem %s310_s21, 1024  ;;  %p5839_p10 = scmp.lt.s32.totalorder %s310_s21, %s310_s21 }
  0x54   : > { %p5832_p11 = scmp.ne.s32.totalorder %s310_s21, %s5831_s25  ;;  %p5840_p12 = scmp.lt.s32.totalorder %s5831_s25, %s5831_s25 }
  0x56   : > { %p5834_p1 = pnand %p5832_p11, %p6089_p7  ;;  %p5841_p13 = por %p5840_p12, %p5839_p10 }
  0x58   : > { %p5835_p4 = pneg %p5834_p1 }
  0x5a   : > { %p5842_p0 = pnand %p5841_p13, %p5835_p4 }
  0x5c   : > { %5845 = shalt.err (!%p5842_p0)
}
  0x5d   : > { %5088 = dma.hbm_to_vmem [thread:$0]  (!%p6083_p6), %s6415_s6, 1024, %s310_s21, [#allocation12], %s5990_s19, %s5990_s19, %s5991_s14  }
  0x5e   : > { %s5996_s9 = smov [#allocation14]  }
  0x5f   : > { %s323_s13 = sshll.u32 %s5996_s9, 4  ;;  %s324_s13 = int_to_ptr.vmem [resolvable:$true] %s323_s13 }
  0x60   : > { %s5857_s10 = scalar_lea.vmem %s324_s13, 272  ;;  %s5864_s18 = scalar_lea.vmem %s324_s13, 288 }
  0x61   : > { %p5858_p2 = scmp.ne.s32.totalorder %s324_s13, %s5857_s10  ;;  %p5865_p9 = scmp.lt.s32.totalorder %s324_s13, %s324_s13 }
  0x62   : > { %p5866_p11 = scmp.lt.s32.totalorder %s5864_s18, %s5857_s10 }
  0x63   : > { %p5860_p5 = pnand %p5858_p2, %p6089_p7 }
  0x64   : > { %p5867_p1 = por %p5866_p11, %p5865_p9 }
  0x65   : > { %p5861_p8 = pneg %p5860_p5 }
  0x67   : > { %p5868_p4 = pnand %p5867_p1, %p5861_p8 }
  0x69   : > { %5871 = shalt.err (!%p5868_p4)
}
  0x6a   : > { %5091 = dma.hbm_to_vmem [thread:$0]  (!%p6083_p6), %s6416_s7, 272, %s324_s13, [#allocation15]  }
  0x6b   : > { %s4430_s16 = sadd.s32 4294967294, %s5980_s30   ;;  %s6156_s15 = sadd.s32 1, %s5980_s30  }
  0x6c   : > { %s35_s19 = sadd.s32 1, %s5976_s29  ;;  %s32_s14 = ssub.s32 %s5980_s30, %s6156_s15 }
  0x6d   : > { %p42_p7 = scmp.ne.s32.totalorder %s5976_s29, %s5972_s28  ;;  %p33_p10 = scmp.eq.s32.totalorder %s32_s14, 0 }
  0x6e   : > { %p43_p12 = scmp.eq.s32.totalorder %s5980_s30, 0  ;;  %p48_p13 = scmp.ne.s32.totalorder %s5972_s28, %s5968_s27 }
  0x6f   : > { %p219_p0 = scmp.eq.s32.totalorder %s6069_s11, 1  ;;  %p6431_p5 = scmp.eq.s32.totalorder %s6069_s11, 0 }
  0x70   : > { %s6168_s21 = scalar_select %p33_p10, %s5976_s29, %s35_s19  }
  0x71   : > { %p44_p2 = por %p43_p12, %p42_p7  ;;  %p6172_p8 = por %p6431_p5, %p48_p13 }
  0x72   : > { %p6176_p6 = por %p219_p0, %p42_p7  ;;  %p225_p9 = scmp.eq.s32.totalorder %s4430_s16, 1 }
  0x73   : > { %s6432_s22 = scalar_select %p6172_p8, 1, 0 }
  0x74   : > { %s6433_s25 = scalar_select %p6176_p6, 1, 0 }
  0x75   : > { %p5107_p11 = scmp.lt.s32.totalorder %s5980_s30, 2  ;;  %s334_s23 = sand.u32 1, %s5976_s29  }
  0x76   : > { %p6182_p1 = por %p225_p9, %p48_p13  ;;  %s4440_s9 = sshll.u32 %s334_s23, 4 }
  0x77   : > { %s4949_s13 = sshll.u32 %s5980_s30, 8  ;;  %s338_s17 = scalar_lea.vmem [#allocation2], %s4440_s9 }
  0x78   : > { %s6434_s26 = scalar_select %p6182_p1, 1, 0 }
  0x79   : > { %s6190_s20 = scalar_lea.hbm %s6409_s0, %s4949_s13  ;;  %s346_s19 = sshll.u32 %s338_s17, 4  ;;  %s6196_s19 = int_to_ptr.vmem [resolvable:$true] %s346_s19 }
  0x7a   : > { %p6192_p4 = pnand %p5107_p11, %p44_p2  ;;  %s6198_s14 = scalar_lea.sflag [#allocation3], %s334_s23 }
  0x7b   : > { %s5872_s24 = scalar_lea.hbm %s6190_s20, 256  ;;  %s5877_s9 = scalar_lea.hbm %s6409_s0, 512 }
  0x7c   : > { %p5873_p7 = scmp.ne.s32.totalorder %s6190_s20, %s5872_s24  ;;  %p5874_p10 = pneg %p6192_p4 }
  0x7d   : > { %p5878_p0 = scmp.lt.s32.totalorder %s6190_s20, %s6409_s0  ;;  %p5879_p2 = scmp.lt.s32.totalorder %s5877_s9, %s5872_s24 }
  0x7e   : > { %p5875_p12 = pnand %p5874_p10, %p5873_p7 }
  0x7f   : > { %p5880_p5 = por %p5879_p2, %p5878_p0 }
  0x80   : > { %p5876_p13 = pneg %p5875_p12 }
  0x82   : > { %p5881_p9 = pnand %p5880_p5, %p5876_p13 }
  0x84   : > { %5884 = shalt.err (!%p5881_p9)
}
  0x85   : > { %s5885_s23 = scalar_lea.vmem %s6196_s19, 256  ;;  %s5997_s1 = smov [#allocation2]  }
  0x86   : > { %p5886_p11 = scmp.ne.s32.totalorder %s6196_s19, %s5885_s23  ;;  %s5890_s2 = sshll.u32 %s5997_s1, 4  ;;  %s5891_s2 = int_to_ptr.vmem [resolvable:$false] %s5890_s2 }
  0x87   : > { %s5892_s13 = scalar_lea.vmem %s5891_s2, 512  ;;  %p5893_p12 = scmp.lt.s32.totalorder %s6196_s19, %s5891_s2 }
  0x88   : > { %p5888_p1 = pnand %p5886_p11, %p5874_p10  ;;  %p5894_p6 = scmp.lt.s32.totalorder %s5892_s13, %s5885_s23 }
  0x8a   : > { %p5889_p7 = pneg %p5888_p1  ;;  %p5895_p8 = por %p5894_p6, %p5893_p12 }
  0x8c   : > { %p5896_p3 = pnand %p5895_p8, %p5889_p7 }
  0x8e   : > { %5899 = shalt.err (!%p5896_p3)
}
  0x8f   : > { %s6436_s24 = smov 8   ;;  %s6437_s10 = smov 128  }
  0x90   : > { %5095 = dma.hbm_to_vmem [thread:$0]  (!%p6192_p4), %s6190_s20, 256, %s6196_s19, %s6198_s14, %s6437_s10, %s6437_s10, %s6436_s24  }
  0x91   : > { %p6438_p1 = scmp.ne.s32.totalorder %s6426_s12, 0 }
  0x92   : > { %s6225_s1 = sand.u32 (!%p6438_p1), 1, %s5972_s28   ;;  %p6439_p3 = scmp.ne.s32.totalorder (!%p6438_p1), %s6432_s22, 0 }
  0x93   : > { %358 = sbr.rel (%p6438_p1) target bundleno = 1704 (0x6a8), region = 52  ;;  %s4445_s2 = sshll.u32 (!%p6438_p1), %s6225_s1, 4 }
  0x94   : > { %s361_s9 = scalar_lea.sflag (!%p6438_p1), [#allocation3], %s6225_s1  ;;  %s6229_s18 = scalar_lea.vmem (!%p6438_p1), [#allocation2], %s4445_s2 }
  0x98   : > { %5943 = dma.done.wait (%p6439_p3), %s361_s9, 256  }
  0x99   : > { %5945 = vsyncadd (%p6439_p3), %s361_s9, 4294967040  ;;  %p6440_p8 = scmp.eq.s32.totalorder %s6069_s11, 0 }
  0x9b   : > { %5947 = dma.done.wait (%p6440_p8), [#allocation6], 49152   ;;  %p6441_p6 = pmov %p6440_p8 }
  0x9d   : > { %5949 = vsyncadd (%p6441_p6), [#allocation6], 4294918144  ;;  %p6442_p4 = pmov %p6441_p6 }
  0x9f   : > { %5951 = dma.done.wait (%p6442_p4), [#allocation9], 10240   ;;  %p6443_p10 = pmov %p6442_p4 }
  0xa0   : > { %p6444_p13 = pmov %p6442_p4 }
  0xa1   : > { %5953 = vsyncadd (%p6443_p10), [#allocation9], 4294957056 }
  0xa2   : > { %5955 = dma.done.wait (%p6444_p13), [#allocation12], 2048   ;;  %p6445_p0 = pmov %p6442_p4 }
  0xa4   : > { %5957 = vsyncadd (%p6445_p0), [#allocation12], 4294965248  ;;  %p6446_p2 = pmov %p6445_p0 }
  0xa5   : > { %p6447_p5 = pmov %p6445_p0 }
  0xa6   : > { %5959 = dma.done.wait (%p6446_p2), [#allocation15], 272  }
  0xa7   : > { %5961 = vsyncadd (%p6447_p5), [#allocation15], 4294967024  ;;  %v486_v0 = vld [vmem:[#allocation5 + $0x1c0] sm:$0xff]  ;;  %v487_v2 = vld [vmem:[#allocation5 + $0x1c8] sm:$0xff]  ;;  %vm5999_vm0 = vmmov 0   ;;  %s4453_s12 = sshll.u32 %s6225_s1, 3 }
  0xa8   : > { %v490_v1 = vld [vmem:[#allocation5 + $0x1e0] sm:$0xff]  ;;  %v491_v4 = vld [vmem:[#allocation5 + $0x1e8] sm:$0xff]  ;;  %s4952_s22 = sshll.u32 %s6069_s11, 7  ;;  %s424_s20 = scalar_lea.vmem [#allocation16], %s4453_s12 }
  0xa9   : > { %v4513_v3 = vcombine.high %v486_v0, %v490_v1  ;;  %v4512_v5 = vcombine.low %v486_v0, %v490_v1  ;;  %v478_v6 = vld [vmem:[#allocation5 + $0x180] sm:$0xff]  ;;  %v4515_v8 = vcombine.high %v487_v2, %v491_v4  ;;  %v4514_v9 = vcombine.low %v487_v2, %v491_v4  ;;  %v479_v11 = vld [vmem:[#allocation5 + $0x188] sm:$0xff]  ;;  %s4290_s19 = sshll.u32 %s424_s20, 4  ;;  %s6364_s17 = scalar_lea.hbm %s6417_s8, %s4952_s22  ;;  %s6366_s19 = int_to_ptr.vmem [resolvable:$true] %s4290_s19 }
  0xaa   : > { %v482_v7 = vld [vmem:[#allocation5 + $0x1a0] sm:$0xff]  ;;  %v483_v12 = vld [vmem:[#allocation5 + $0x1a8] sm:$0xff]  ;;  %s4277_s23 = scalar_lea.sflag [#allocation4], %s6225_s1  ;;  %s5900_s13 = scalar_lea.vmem %s6366_s19, 128 }
  0xab   : > { %v4505_v10 = vcombine.high %v478_v6, %v482_v7  ;;  %v470_v13 = vld [vmem:[#allocation5 + $0x140] sm:$0xff]  ;;  %1250 = vmatprep.subr.bf16.mxu0 %v4513_v3  ;;  %v4507_v14 = vcombine.high %v479_v11, %v483_v12  ;;  %v471_v16 = vld [vmem:[#allocation5 + $0x148] sm:$0xff]  ;;  %1293 = vmatprep.subr.bf16.mxu1 %v4515_v8  ;;  %v4504_v18 = vcombine.low %v478_v6, %v482_v7  ;;  %p5901_p9 = scmp.ne.s32.totalorder %s6366_s19, %s5900_s13  ;;  %p6448_p11 = scmp.ne.s32.totalorder %s6433_s25, 0 }
  0xac   : > { %v474_v15 = vld [vmem:[#allocation5 + $0x160] sm:$0xff]  ;;  %v475_v17 = vld [vmem:[#allocation5 + $0x168] sm:$0xff]  ;;  %1251 = vmatpush1.bf16.msra.mxu0 %v4512_v5  ;;  %1294 = vmatpush1.bf16.msra.mxu1 %v4514_v9  ;;  %v4506_v19 = vcombine.low %v479_v11, %v483_v12  ;;  %s6000_s11 = smov [#allocation16]  }
  0xad   : > { %1252 = vmatprep.subr.bf16.mxu0 %v4505_v10  ;;  %v4497_v20 = vcombine.high %v470_v13, %v474_v15  ;;  %1295 = vmatprep.subr.bf16.mxu1 %v4507_v14  ;;  %v4499_v21 = vcombine.high %v471_v16, %v475_v17  ;;  %v462_v22 = vld [vmem:[#allocation5 + $0x100] sm:$0xff]  ;;  %v463_v24 = vld [vmem:[#allocation5 + $0x108] sm:$0xff]  ;;  %v4496_v26 = vcombine.low %v470_v13, %v474_v15  ;;  %p5902_p7 = pnand %p5901_p9, %p6448_p11  ;;  %s5904_s24 = sshll.u32 %s6000_s11, 4  ;;  %s5905_s24 = int_to_ptr.vmem [resolvable:$false] %s5904_s24 }
  0xae   : > { %v466_v23 = vld [vmem:[#allocation5 + $0x120] sm:$0xff]  ;;  %v467_v25 = vld [vmem:[#allocation5 + $0x128] sm:$0xff]  ;;  %v4498_v27 = vcombine.low %v471_v16, %v475_v17  ;;  %s5906_s10 = scalar_lea.vmem %s5905_s24, 256  ;;  %p5907_p1 = scmp.lt.s32.totalorder %s6366_s19, %s5905_s24 }
  0xaf   : > { %v4489_v28 = vcombine.high %v462_v22, %v466_v23  ;;  %v4491_v29 = vcombine.high %v463_v24, %v467_v25  ;;  %v454_v30 = vld [vmem:[#allocation5 + $0xc0] sm:$0xff]  ;;  %v455_v32 = vld [vmem:[#allocation5 + $0xc8] sm:$0xff]  ;;  %v4488_v34 = vcombine.low %v462_v22, %v466_v23  ;;  %v4490_v35 = vcombine.low %v463_v24, %v467_v25  ;;  %p5903_p12 = pneg %p5902_p7  ;;  %p5908_p3 = scmp.lt.s32.totalorder %s5906_s10, %s5900_s13 }
  0xb0   : > { %1253 = vmatpush1.bf16.msra.mxu0 %v4504_v18  ;;  %1296 = vmatpush1.bf16.msra.mxu1 %v4506_v19  ;;  %v458_v31 = vld [vmem:[#allocation5 + $0xe0] sm:$0xff]  ;;  %v459_v33 = vld [vmem:[#allocation5 + $0xe8] sm:$0xff] }
  0xb1   : > { %1254 = vmatprep.subr.bf16.mxu0 %v4497_v20  ;;  %1297 = vmatprep.subr.bf16.mxu1 %v4499_v21  ;;  %v4481_v36 = vcombine.high %v454_v30, %v458_v31  ;;  %v4483_v37 = vcombine.high %v455_v32, %v459_v33  ;;  %v446_v38 = vld [vmem:[#allocation5 + $0x80] sm:$0xff]  ;;  %v447_v40 = vld [vmem:[#allocation5 + $0x88] sm:$0xff]  ;;  %v4480_v42 = vcombine.low %v454_v30, %v458_v31  ;;  %p5909_p8 = por %p5908_p3, %p5907_p1 }
  0xb2   : > { %v450_v39 = vld [vmem:[#allocation5 + $0xa0] sm:$0xff]  ;;  %v451_v41 = vld [vmem:[#allocation5 + $0xa8] sm:$0xff]  ;;  %v4482_v43 = vcombine.low %v455_v32, %v459_v33 }
  0xb3   : > { %v4473_v44 = vcombine.high %v446_v38, %v450_v39  ;;  %v4475_v45 = vcombine.high %v447_v40, %v451_v41  ;;  %v438_v46 = vld [vmem:[#allocation5 + $0x40] sm:$0xff]  ;;  %v439_v48 = vld [vmem:[#allocation5 + $0x48] sm:$0xff]  ;;  %v4472_v50 = vcombine.low %v446_v38, %v450_v39  ;;  %v4474_v51 = vcombine.low %v447_v40, %v451_v41  ;;  %p5910_p6 = pnand %p5909_p8, %p5903_p12 }
  0xb4   : > { %1255 = vmatpush1.bf16.msra.mxu0 %v4496_v26  ;;  %1298 = vmatpush1.bf16.msra.mxu1 %v4498_v27  ;;  %v442_v47 = vld [vmem:[#allocation5 + $0x60] sm:$0xff]  ;;  %v443_v49 = vld [vmem:[#allocation5 + $0x68] sm:$0xff] }
  0xb5   : > { %1256 = vmatprep.subr.bf16.mxu0 %v4489_v28  ;;  %1299 = vmatprep.subr.bf16.mxu1 %v4491_v29  ;;  %v4465_v52 = vcombine.high %v438_v46, %v442_v47  ;;  %v4467_v53 = vcombine.high %v439_v48, %v443_v49  ;;  %v430_v54 = vld [vmem:[#allocation5] sm:$0xff]  ;;  %v431_v57 = vld [vmem:[#allocation5 + $0x8] sm:$0xff]  ;;  %v4464_v59 = vcombine.low %v438_v46, %v442_v47 }
  0xb6   : > { %v434_v55 = vld [vmem:[#allocation5 + $0x20] sm:$0xff]  ;;  %v435_v58 = vld [vmem:[#allocation5 + $0x28] sm:$0xff]  ;;  %v4466_v60 = vcombine.low %v439_v48, %v443_v49 }
  0xb7   : > { %v6252_v56 = vld [vmem:[%s6229_s18 + $0x4] ss:$8 sps:$4 sm:$0xff]   ;;  %v4457_v61 = vcombine.high %v430_v54, %v434_v55  ;;  %v4459_v62 = vcombine.high %v431_v57, %v435_v58  ;;  %v4456_v3 = vcombine.low %v430_v54, %v434_v55  ;;  %v4458_v4 = vcombine.low %v431_v57, %v435_v58 }
  0xb8   : > { %1257 = vmatpush1.bf16.msra.mxu0 %v4488_v34  ;;  %1300 = vmatpush1.bf16.msra.mxu1 %v4490_v35  ;;  %v550_v63 = vld [vmem:[#allocation5 + $0x3c0] sm:$0xff]  ;;  %v551_v1 = vld [vmem:[#allocation5 + $0x3c8] sm:$0xff] }
  0xb9   : > { %1258 = vmatprep.subr.bf16.mxu0 %v4481_v36  ;;  %1301 = vmatprep.subr.bf16.mxu1 %v4483_v37  ;;  %v554_v0 = vld [vmem:[#allocation5 + $0x3e0] sm:$0xff]  ;;  %v555_v2 = vld [vmem:[#allocation5 + $0x3e8] sm:$0xff] }
  0xba   : > { %1282 = vmatprep.mubr.bf16.mxu0 %v6252_v56  ;;  %1325 = vmatprep.mubr.bf16.mxu1 %v6252_v56  ;;  %v4577_v5 = vcombine.high %v550_v63, %v554_v0  ;;  %v4579_v6 = vcombine.high %v551_v1, %v555_v2  ;;  %v542_v7 = vld [vmem:[#allocation5 + $0x380] sm:$0xff]  ;;  %v543_v9 = vld [vmem:[#allocation5 + $0x388] sm:$0xff]  ;;  %v4576_v11 = vcombine.low %v550_v63, %v554_v0  ;;  %v488_v0 = vld [vmem:[#allocation5 + $0x1d0] sm:$0xff] }
  0xbb   : > { %v546_v8 = vld [vmem:[#allocation5 + $0x3a0] sm:$0xff]  ;;  %v547_v10 = vld [vmem:[#allocation5 + $0x3a8] sm:$0xff]  ;;  %v4578_v12 = vcombine.low %v551_v1, %v555_v2  ;;  %v492_v1 = vld [vmem:[#allocation5 + $0x1f0] sm:$0xff] }
  0xbc   : > { %1259 = vmatpush1.bf16.msra.mxu0 %v4480_v42  ;;  %1302 = vmatpush1.bf16.msra.mxu1 %v4482_v43  ;;  %v4569_v13 = vcombine.high %v542_v7, %v546_v8  ;;  %v4571_v14 = vcombine.high %v543_v9, %v547_v10  ;;  %v534_v15 = vld [vmem:[#allocation5 + $0x340] sm:$0xff]  ;;  %v535_v17 = vld [vmem:[#allocation5 + $0x348] sm:$0xff]  ;;  %v4568_v19 = vcombine.low %v542_v7, %v546_v8  ;;  %v489_v2 = vld [vmem:[#allocation5 + $0x1d8] sm:$0xff] }
  0xbd   : > { %1260 = vmatprep.subr.bf16.mxu0 %v4473_v44  ;;  %1303 = vmatprep.subr.bf16.mxu1 %v4475_v45  ;;  %v538_v16 = vld [vmem:[#allocation5 + $0x360] sm:$0xff]  ;;  %v539_v18 = vld [vmem:[#allocation5 + $0x368] sm:$0xff]  ;;  %v4570_v20 = vcombine.low %v543_v9, %v547_v10  ;;  %v4517_v7 = vcombine.high %v488_v0, %v492_v1  ;;  %v480_v9 = vld [vmem:[#allocation5 + $0x190] sm:$0xff] }
  0xbe   : > { %v4561_v21 = vcombine.high %v534_v15, %v538_v16  ;;  %v4563_v22 = vcombine.high %v535_v17, %v539_v18  ;;  %v526_v23 = vld [vmem:[#allocation5 + $0x300] sm:$0xff]  ;;  %v527_v25 = vld [vmem:[#allocation5 + $0x308] sm:$0xff]  ;;  %v4560_v27 = vcombine.low %v534_v15, %v538_v16  ;;  %v4562_v28 = vcombine.low %v535_v17, %v539_v18  ;;  %v484_v10 = vld [vmem:[#allocation5 + $0x1b0] sm:$0xff] }
  0xbf   : > { %v530_v24 = vld [vmem:[#allocation5 + $0x320] sm:$0xff]  ;;  %v531_v26 = vld [vmem:[#allocation5 + $0x328] sm:$0xff]  ;;  %v4509_v15 = vcombine.high %v480_v9, %v484_v10  ;;  %v472_v17 = vld [vmem:[#allocation5 + $0x150] sm:$0xff] }
  0xc0   : > { %1261 = vmatpush1.bf16.msra.mxu0 %v4472_v50  ;;  %1304 = vmatpush1.bf16.msra.mxu1 %v4474_v51  ;;  %v4553_v29 = vcombine.high %v526_v23, %v530_v24  ;;  %v4555_v30 = vcombine.high %v527_v25, %v531_v26  ;;  %v518_v31 = vld [vmem:[#allocation5 + $0x2c0] sm:$0xff]  ;;  %v519_v33 = vld [vmem:[#allocation5 + $0x2c8] sm:$0xff]  ;;  %v4552_v35 = vcombine.low %v526_v23, %v530_v24  ;;  %v476_v18 = vld [vmem:[#allocation5 + $0x170] sm:$0xff] }
  0xc1   : > { %1262 = vmatprep.subr.bf16.mxu0 %v4465_v52  ;;  %1305 = vmatprep.subr.bf16.mxu1 %v4467_v53  ;;  %v522_v32 = vld [vmem:[#allocation5 + $0x2e0] sm:$0xff]  ;;  %v523_v34 = vld [vmem:[#allocation5 + $0x2e8] sm:$0xff]  ;;  %v4554_v36 = vcombine.low %v527_v25, %v531_v26  ;;  %v4501_v23 = vcombine.high %v472_v17, %v476_v18  ;;  %v464_v25 = vld [vmem:[#allocation5 + $0x110] sm:$0xff] }
  0xc2   : > { %v4545_v37 = vcombine.high %v518_v31, %v522_v32  ;;  %v4547_v38 = vcombine.high %v519_v33, %v523_v34  ;;  %v510_v39 = vld [vmem:[#allocation5 + $0x280] sm:$0xff]  ;;  %v511_v41 = vld [vmem:[#allocation5 + $0x288] sm:$0xff]  ;;  %v4544_v43 = vcombine.low %v518_v31, %v522_v32  ;;  %v4546_v44 = vcombine.low %v519_v33, %v523_v34  ;;  %v468_v26 = vld [vmem:[#allocation5 + $0x130] sm:$0xff] }
  0xc3   : > { %v514_v40 = vld [vmem:[#allocation5 + $0x2a0] sm:$0xff]  ;;  %v515_v42 = vld [vmem:[#allocation5 + $0x2a8] sm:$0xff]  ;;  %v4493_v31 = vcombine.high %v464_v25, %v468_v26  ;;  %v456_v33 = vld [vmem:[#allocation5 + $0xd0] sm:$0xff] }
  0xc4   : > { %1263 = vmatpush1.bf16.msra.mxu0 %v4464_v59  ;;  %1306 = vmatpush1.bf16.msra.mxu1 %v4466_v60  ;;  %v4537_v45 = vcombine.high %v510_v39, %v514_v40  ;;  %v4539_v46 = vcombine.high %v511_v41, %v515_v42  ;;  %v502_v47 = vld [vmem:[#allocation5 + $0x240] sm:$0xff]  ;;  %v503_v49 = vld [vmem:[#allocation5 + $0x248] sm:$0xff]  ;;  %v4536_v51 = vcombine.low %v510_v39, %v514_v40  ;;  %v460_v34 = vld [vmem:[#allocation5 + $0xf0] sm:$0xff] }
  0xc5   : > { %1264 = vmatprep.subr.bf16.mxu0 %v4457_v61  ;;  %1307 = vmatprep.subr.bf16.mxu1 %v4459_v62  ;;  %v506_v48 = vld [vmem:[#allocation5 + $0x260] sm:$0xff]  ;;  %v507_v50 = vld [vmem:[#allocation5 + $0x268] sm:$0xff]  ;;  %v4538_v52 = vcombine.low %v511_v41, %v515_v42  ;;  %v4485_v39 = vcombine.high %v456_v33, %v460_v34  ;;  %v448_v40 = vld [vmem:[#allocation5 + $0x90] sm:$0xff] }
  0xc6   : > { %v4529_v53 = vcombine.high %v502_v47, %v506_v48  ;;  %v4531_v54 = vcombine.high %v503_v49, %v507_v50  ;;  %v494_v55 = vld [vmem:[#allocation5 + $0x200] sm:$0xff]  ;;  %v495_v58 = vld [vmem:[#allocation5 + $0x208] sm:$0xff]  ;;  %v4528_v60 = vcombine.low %v502_v47, %v506_v48  ;;  %v4530_v61 = vcombine.low %v503_v49, %v507_v50  ;;  %v452_v41 = vld [vmem:[#allocation5 + $0xb0] sm:$0xff] }
  0xc7   : > { %v498_v57 = vld [vmem:[#allocation5 + $0x220] sm:$0xff]  ;;  %v499_v59 = vld [vmem:[#allocation5 + $0x228] sm:$0xff]  ;;  %v449_v42 = vld [vmem:[#allocation5 + $0x98] sm:$0xff]  ;;  %v4477_v48 = vcombine.high %v448_v40, %v452_v41 }
  0xc8   : > { %1265 = vmatpush1.bf16.msra.mxu0 %v4456_v3  ;;  %1308 = vmatpush1.bf16.msra.mxu1 %v4458_v4  ;;  %v4521_v62 = vcombine.high %v494_v55, %v498_v57  ;;  %v4523_v63 = vcombine.high %v495_v58, %v499_v59  ;;  %v493_v3 = vld [vmem:[#allocation5 + $0x1f8] sm:$0xff]  ;;  %v4520_v4 = vcombine.low %v494_v55, %v498_v57 }
  0xc9   : > { %1266 = vmatprep.subr.bf16.mxu0 %v4577_v5  ;;  %1309 = vmatprep.subr.bf16.mxu1 %v4579_v6  ;;  %v4522_v5 = vcombine.low %v495_v58, %v499_v59  ;;  %v6257_v6 = vld [vmem:[%s6229_s18] ss:$8 sps:$4 sm:$0xff]   ;;  %v4519_v8 = vcombine.high %v489_v2, %v493_v3 }
  0xca   : > { %v441_v49 = vld [vmem:[#allocation5 + $0x58] sm:$0xff] }
  0xcb   : > { %v445_v50 = vld [vmem:[#allocation5 + $0x78] sm:$0xff] }
  0xcc   : > { %1267 = vmatpush2.bf16.msra.mxu0 %v4576_v11  ;;  %1310 = vmatpush2.bf16.msra.mxu1 %v4578_v12  ;;  %v481_v11 = vld [vmem:[#allocation5 + $0x198] sm:$0xff] }
  0xcd   : > { %1268 = vmatprep.subr.bf16.mxu0 %v4569_v13  ;;  %1311 = vmatprep.subr.bf16.mxu1 %v4571_v14  ;;  %v485_v12 = vld [vmem:[#allocation5 + $0x1b8] sm:$0xff]  ;;  %v4516_v13 = vcombine.low %v488_v0, %v492_v1  ;;  %v4518_v14 = vcombine.low %v489_v2, %v493_v3  ;;  %v4470_v0 = vcombine.low %v441_v49, %v445_v50 }
  0xce   : > { %v4511_v16 = vcombine.high %v481_v11, %v485_v12  ;;  %v433_v58 = vld [vmem:[#allocation5 + $0x18] sm:$0xff] }
  0xcf   : > { %v437_v59 = vld [vmem:[#allocation5 + $0x38] sm:$0xff] }
  0xd0   : > { %1269 = vmatpush2.bf16.msra.mxu0 %v4568_v19  ;;  %1312 = vmatpush2.bf16.msra.mxu1 %v4570_v20  ;;  %v473_v19 = vld [vmem:[#allocation5 + $0x158] sm:$0xff] }
  0xd1   : > { %1270 = vmatprep.subr.bf16.mxu0 %v4561_v21  ;;  %1313 = vmatprep.subr.bf16.mxu1 %v4563_v22  ;;  %v477_v20 = vld [vmem:[#allocation5 + $0x178] sm:$0xff]  ;;  %v4508_v21 = vcombine.low %v480_v9, %v484_v10  ;;  %v4510_v22 = vcombine.low %v481_v11, %v485_v12  ;;  %v4462_v9 = vcombine.low %v433_v58, %v437_v59 }
  0xd2   : > { %v4503_v24 = vcombine.high %v473_v19, %v477_v20  ;;  %v553_v2 = vld [vmem:[#allocation5 + $0x3d8] sm:$0xff] }
  0xd3   : > { %v557_v3 = vld [vmem:[#allocation5 + $0x3f8] sm:$0xff] }
  0xd4   : > { %1271 = vmatpush2.bf16.msra.mxu0 %v4560_v27  ;;  %1314 = vmatpush2.bf16.msra.mxu1 %v4562_v28  ;;  %v465_v27 = vld [vmem:[#allocation5 + $0x118] sm:$0xff] }
  0xd5   : > { %1272 = vmatprep.subr.bf16.mxu0 %v4553_v29  ;;  %1315 = vmatprep.subr.bf16.mxu1 %v4555_v30  ;;  %v469_v28 = vld [vmem:[#allocation5 + $0x138] sm:$0xff]  ;;  %v4500_v29 = vcombine.low %v472_v17, %v476_v18  ;;  %v4502_v30 = vcombine.low %v473_v19, %v477_v20  ;;  %v4582_v17 = vcombine.low %v553_v2, %v557_v3 }
  0xd6   : > { %v4495_v32 = vcombine.high %v465_v27, %v469_v28  ;;  %v545_v11 = vld [vmem:[#allocation5 + $0x398] sm:$0xff] }
  0xd7   : > { %v549_v12 = vld [vmem:[#allocation5 + $0x3b8] sm:$0xff] }
  0xd8   : > { %1273 = vmatpush2.bf16.msra.mxu0 %v4552_v35  ;;  %1316 = vmatpush2.bf16.msra.mxu1 %v4554_v36  ;;  %v457_v35 = vld [vmem:[#allocation5 + $0xd8] sm:$0xff] }
  0xd9   : > { %1274 = vmatprep.subr.bf16.mxu0 %v4545_v37  ;;  %1317 = vmatprep.subr.bf16.mxu1 %v4547_v38  ;;  %v461_v36 = vld [vmem:[#allocation5 + $0xf8] sm:$0xff]  ;;  %v4492_v37 = vcombine.low %v464_v25, %v468_v26  ;;  %v4494_v38 = vcombine.low %v465_v27, %v469_v28  ;;  %v4574_v25 = vcombine.low %v545_v11, %v549_v12 }
  0xda   : > { %v4486_v47 = vcombine.low %v457_v35, %v461_v36  ;;  %v537_v19 = vld [vmem:[#allocation5 + $0x358] sm:$0xff] }
  0xdb   : > { %v541_v20 = vld [vmem:[#allocation5 + $0x378] sm:$0xff] }
  0xdc   : > { %1275 = vmatpush2.bf16.msra.mxu0 %v4544_v43  ;;  %1318 = vmatpush2.bf16.msra.mxu1 %v4546_v44  ;;  %v453_v43 = vld [vmem:[#allocation5 + $0xb8] sm:$0xff]  ;;  %v4484_v44 = vcombine.low %v456_v33, %v460_v34  ;;  %v4566_v33 = vcombine.low %v537_v19, %v541_v20 }
  0xdd   : > { %1276 = vmatprep.subr.bf16.mxu0 %v4537_v45  ;;  %1319 = vmatprep.subr.bf16.mxu1 %v4539_v46  ;;  %v440_v45 = vld [vmem:[#allocation5 + $0x50] sm:$0xff]  ;;  %v4478_v55 = vcombine.low %v449_v42, %v453_v43  ;;  %v529_v27 = vld [vmem:[#allocation5 + $0x318] sm:$0xff] }
  0xde   : > { %v444_v46 = vld [vmem:[#allocation5 + $0x70] sm:$0xff]  ;;  %v533_v28 = vld [vmem:[#allocation5 + $0x338] sm:$0xff] }
  0xdf   : > { %v4469_v57 = vcombine.high %v440_v45, %v444_v46 }
  0xe0   : > { %1277 = vmatpush2.bf16.msra.mxu0 %v4536_v51  ;;  %1320 = vmatpush2.bf16.msra.mxu1 %v4538_v52  ;;  %v4479_v51 = vcombine.high %v449_v42, %v453_v43  ;;  %v4476_v52 = vcombine.low %v448_v40, %v452_v41  ;;  %v516_v40 = vld [vmem:[#allocation5 + $0x2b0] sm:$0xff]  ;;  %v513_v42 = vld [vmem:[#allocation5 + $0x298] sm:$0xff] }
  0xe1   : > { %1278 = vmatprep.subr.bf16.mxu0 %v4529_v53  ;;  %1321 = vmatprep.subr.bf16.mxu1 %v4531_v54  ;;  %v432_v53 = vld [vmem:[#allocation5 + $0x10] sm:$0xff]  ;;  %v517_v43 = vld [vmem:[#allocation5 + $0x2b8] sm:$0xff] }
  0xe2   : > { %v436_v54 = vld [vmem:[#allocation5 + $0x30] sm:$0xff] }
  0xe3   : > { %v4461_v1 = vcombine.high %v432_v53, %v436_v54 }
  0xe4   : > { %1279 = vmatpush2.bf16.msra.mxu0 %v4528_v60  ;;  %1322 = vmatpush2.bf16.msra.mxu1 %v4530_v61  ;;  %v4471_v60 = vcombine.high %v441_v49, %v445_v50  ;;  %v4468_v61 = vcombine.low %v440_v45, %v444_v46  ;;  %v504_v46 = vld [vmem:[#allocation5 + $0x250] sm:$0xff]  ;;  %v505_v50 = vld [vmem:[#allocation5 + $0x258] sm:$0xff] }
  0xe5   : > { %1280 = vmatprep.subr.bf16.mxu0 %v4521_v62  ;;  %1323 = vmatprep.subr.bf16.mxu1 %v4523_v63  ;;  %v552_v62 = vld [vmem:[#allocation5 + $0x3d0] sm:$0xff] }
  0xe6   : > { %v556_v63 = vld [vmem:[#allocation5 + $0x3f0] sm:$0xff] }
  0xe7   : > { %v4581_v10 = vcombine.high %v552_v62, %v556_v63 }
  0xe8   : > { %1281 = vmatpush2.bf16.msra.mxu0 %v4520_v4  ;;  %1324 = vmatpush2.bf16.msra.mxu1 %v4522_v5  ;;  %v4463_v4 = vcombine.high %v433_v58, %v437_v59  ;;  %v4460_v5 = vcombine.low %v432_v53, %v436_v54  ;;  %v496_v54 = vld [vmem:[#allocation5 + $0x210] sm:$0xff]  ;;  %v497_v59 = vld [vmem:[#allocation5 + $0x218] sm:$0xff] }
  0xe9   : > { %1336 = vmatprep.subr.bf16.mxu0 %v4517_v7  ;;  %1379 = vmatprep.subr.bf16.mxu1 %v4519_v8  ;;  %v544_v7 = vld [vmem:[#allocation5 + $0x390] sm:$0xff] }
  0xea   : > { %v548_v8 = vld [vmem:[#allocation5 + $0x3b0] sm:$0xff] }
  0xeb   : > { %1283 = vmatmul.mubr.bf16.vlgmr.msra.gmra.mxu0 %v6257_v6  ;;  %1326 = vmatmul.mubr.bf16.vlgmr.msra.gmra.mxu1 %v6257_v6  ;;  %v4573_v18 = vcombine.high %v544_v7, %v548_v8 }
  0xec   : > { %1337 = vmatpush1.bf16.msra.mxu0 %v4516_v13  ;;  %1380 = vmatpush1.bf16.msra.mxu1 %v4518_v14  ;;  %v4583_v13 = vcombine.high %v553_v2, %v557_v3  ;;  %v4580_v14 = vcombine.low %v552_v62, %v556_v63  ;;  %v5172_v2 = vld [vmem:[#allocation7 + $0xe4] ss:$16 sps:$4 sm:$0xff]  }
  0xed   : > { %1338 = vmatprep.subr.bf16.mxu0 %v4509_v15  ;;  %1381 = vmatprep.subr.bf16.mxu1 %v4511_v16  ;;  %v536_v15 = vld [vmem:[#allocation5 + $0x350] sm:$0xff] }
  0xee   : > { %1368 = vmatprep.mubr.bf16.mxu0 %v6252_v56  ;;  %1411 = vmatprep.mubr.bf16.mxu1 %v6252_v56  ;;  %v4487_v56 = vcombine.high %v457_v35, %v461_v36  ;;  %v540_v16 = vld [vmem:[#allocation5 + $0x370] sm:$0xff]  ;;  %v521_v35 = vld [vmem:[#allocation5 + $0x2d8] sm:$0xff] }
  0xef   : > { %v4565_v26 = vcombine.high %v536_v15, %v540_v16  ;;  %v525_v36 = vld [vmem:[#allocation5 + $0x2f8] sm:$0xff] }
  0xf0   : > { %1339 = vmatpush1.bf16.msra.mxu0 %v4508_v21  ;;  %1382 = vmatpush1.bf16.msra.mxu1 %v4510_v22  ;;  %v4575_v21 = vcombine.high %v545_v11, %v549_v12  ;;  %v4572_v22 = vcombine.low %v544_v7, %v548_v8  ;;  %v5170_v7 = vld [vmem:[#allocation7 + $0xe0] ss:$16 sps:$4 sm:$0xff]  }
  0xf1   : > { %1340 = vmatprep.subr.bf16.mxu0 %v4501_v23  ;;  %1383 = vmatprep.subr.bf16.mxu1 %v4503_v24  ;;  %v528_v23 = vld [vmem:[#allocation5 + $0x310] sm:$0xff] }
  0xf2   : > { %v532_v24 = vld [vmem:[#allocation5 + $0x330] sm:$0xff] }
  0xf3   : > { %v4557_v34 = vcombine.high %v528_v23, %v532_v24  ;;  %v5173_v8 = vld [vmem:[#allocation7 + $0x2e0] ss:$16 sps:$4 sm:$0xff]  }
  0xf4   : > { %1341 = vmatpush1.bf16.msra.mxu0 %v4500_v29  ;;  %1384 = vmatpush1.bf16.msra.mxu1 %v4502_v30  ;;  %v4567_v29 = vcombine.high %v537_v19, %v541_v20  ;;  %v4564_v30 = vcombine.low %v536_v15, %v540_v16  ;;  %v5176_v11 = vld [vmem:[#allocation7 + $0xc0] ss:$16 sps:$4 sm:$0xff]  }
  0xf5   : > { %1342 = vmatprep.subr.bf16.mxu0 %v4493_v31  ;;  %1385 = vmatprep.subr.bf16.mxu1 %v4495_v32  ;;  %v520_v31 = vld [vmem:[#allocation5 + $0x2d0] sm:$0xff] }
  0xf6   : > { %v524_v32 = vld [vmem:[#allocation5 + $0x2f0] sm:$0xff] }
  0xf7   : > { %v4549_v41 = vcombine.high %v520_v31, %v524_v32  ;;  %v4548_v45 = vcombine.low %v520_v31, %v524_v32  ;;  %v5179_v12 = vld [vmem:[#allocation7 + $0x2c0] ss:$16 sps:$4 sm:$0xff]   ;;  %v5214_v32 = vld [vmem:[#allocation7 + $0x4] ss:$16 sps:$4 sm:$0xff]  }
  0xf8   : > { %1343 = vmatpush1.bf16.msra.mxu0 %v4492_v37  ;;  %1386 = vmatpush1.bf16.msra.mxu1 %v4494_v38  ;;  %v4559_v37 = vcombine.high %v529_v27, %v533_v28  ;;  %v4556_v38 = vcombine.low %v528_v23, %v532_v24  ;;  %v5182_v15 = vld [vmem:[#allocation7 + $0xa0] ss:$16 sps:$4 sm:$0xff]   ;;  %v5202_v24 = vld [vmem:[#allocation7 + $0x44] ss:$16 sps:$4 sm:$0xff]  }
  0xf9   : > { %1344 = vmatprep.subr.bf16.mxu0 %v4485_v39  ;;  %1387 = vmatprep.subr.bf16.mxu1 %v4487_v56  ;;  %v512_v39 = vld [vmem:[#allocation5 + $0x290] sm:$0xff]  ;;  %v4558_v56 = vcombine.low %v529_v27, %v533_v28 }
  0xfa   : > { %v4541_v49 = vcombine.high %v512_v39, %v516_v40  ;;  %v4540_v53 = vcombine.low %v512_v39, %v516_v40  ;;  %v5185_v16 = vld [vmem:[#allocation7 + $0x2a0] ss:$16 sps:$4 sm:$0xff]   ;;  %v5208_v28 = vld [vmem:[#allocation7 + $0x24] ss:$16 sps:$4 sm:$0xff]  }
  0xfb   : > { %v5188_v19 = vld [vmem:[#allocation7 + $0x80] ss:$16 sps:$4 sm:$0xff]   ;;  %v5226_v40 = vld [vmem:[#allocation7 + $0x1c4] ss:$16 sps:$4 sm:$0xff]  }
  0xfc   : > { %1345 = vmatpush1.bf16.msra.mxu0 %v4484_v44  ;;  %1388 = vmatpush1.bf16.msra.mxu1 %v4486_v47  ;;  %v4551_v44 = vcombine.high %v521_v35, %v525_v36  ;;  %v508_v47 = vld [vmem:[#allocation5 + $0x270] sm:$0xff] }
  0xfd   : > { %1346 = vmatprep.subr.bf16.mxu0 %v4477_v48  ;;  %1389 = vmatprep.subr.bf16.mxu1 %v4479_v51  ;;  %v4550_v48 = vcombine.low %v521_v35, %v525_v36  ;;  %v509_v51 = vld [vmem:[#allocation5 + $0x278] sm:$0xff]  ;;  %v4533_v58 = vcombine.high %v504_v46, %v508_v47  ;;  %v4532_v62 = vcombine.low %v504_v46, %v508_v47  ;;  %v5191_v20 = vld [vmem:[#allocation7 + $0x280] ss:$16 sps:$4 sm:$0xff]   ;;  %v5220_v36 = vld [vmem:[#allocation7 + $0x1e4] ss:$16 sps:$4 sm:$0xff]  }
  0xfe   : > { %v4534_v63 = vcombine.low %v505_v50, %v509_v51  ;;  %v5197_v23 = vld [vmem:[#allocation7 + $0x260] ss:$16 sps:$4 sm:$0xff]   ;;  %v5238_v47 = vld [vmem:[#allocation7 + $0x184] ss:$16 sps:$4 sm:$0xff]  }
  0xff   : > { %v5203_v27 = vld [vmem:[#allocation7 + $0x240] ss:$16 sps:$4 sm:$0xff]  }
 0x100   : > { %1347 = vmatpush1.bf16.msra.mxu0 %v4476_v52  ;;  %1390 = vmatpush1.bf16.msra.mxu1 %v4478_v55  ;;  %v4543_v52 = vcombine.high %v513_v42, %v517_v43  ;;  %v500_v55 = vld [vmem:[#allocation5 + $0x230] sm:$0xff] }
 0x101   : > { %1348 = vmatprep.subr.bf16.mxu0 %v4469_v57  ;;  %1391 = vmatprep.subr.bf16.mxu1 %v4471_v60  ;;  %v4542_v57 = vcombine.low %v513_v42, %v517_v43  ;;  %v501_v60 = vld [vmem:[#allocation5 + $0x238] sm:$0xff]  ;;  %v4524_v3 = vcombine.low %v496_v54, %v500_v55  ;;  %v5209_v31 = vld [vmem:[#allocation7 + $0x220] ss:$16 sps:$4 sm:$0xff]   ;;  %v5232_v43 = vld [vmem:[#allocation7 + $0x1a4] ss:$16 sps:$4 sm:$0xff]  }
 0x102   : > { %v5215_v35 = vld [vmem:[#allocation7 + $0x200] ss:$16 sps:$4 sm:$0xff]  }
 0x103   : > { %v5221_v39 = vld [vmem:[#allocation7 + $0x3e0] ss:$16 sps:$4 sm:$0xff]  }
 0x104   : > { %1349 = vmatpush1.bf16.msra.mxu0 %v4468_v61  ;;  %1392 = vmatpush1.bf16.msra.mxu1 %v4470_v0  ;;  %v4535_v61 = vcombine.high %v505_v50, %v509_v51  ;;  %v4525_v0 = vcombine.high %v496_v54, %v500_v55  ;;  %v5227_v42 = vld [vmem:[#allocation7 + $0x3c0] ss:$16 sps:$4 sm:$0xff]   ;;  %v5244_v51 = vld [vmem:[#allocation7 + $0x164] ss:$16 sps:$4 sm:$0xff]  }
 0x105   : > { %1350 = vmatprep.subr.bf16.mxu0 %v4461_v1  ;;  %1393 = vmatprep.subr.bf16.mxu1 %v4463_v4  ;;  %v4527_v1 = vcombine.high %v497_v59, %v501_v60  ;;  %v5175_v4 = vld [vmem:[#allocation7 + $0x2e4] ss:$16 sps:$4 sm:$0xff]   ;;  %v5233_v46 = vld [vmem:[#allocation7 + $0x3a0] ss:$16 sps:$4 sm:$0xff]  }
 0x106   : > { %v5239_v50 = vld [vmem:[#allocation7 + $0x380] ss:$16 sps:$4 sm:$0xff]   ;;  %v5250_v55 = vld [vmem:[#allocation7 + $0x144] ss:$16 sps:$4 sm:$0xff]  }
 0x107   : > { %v5245_v54 = vld [vmem:[#allocation7 + $0x360] ss:$16 sps:$4 sm:$0xff]  }
 0x108   : > { %1351 = vmatpush1.bf16.msra.mxu0 %v4460_v5  ;;  %1394 = vmatpush1.bf16.msra.mxu1 %v4462_v9  ;;  %v4526_v5 = vcombine.low %v497_v59, %v501_v60  ;;  %v5178_v9 = vld [vmem:[#allocation7 + $0xc4] ss:$16 sps:$4 sm:$0xff]   ;;  %v5251_v59 = vld [vmem:[#allocation7 + $0x340] ss:$16 sps:$4 sm:$0xff]  }
 0x109   : > { %1352 = vmatprep.subr.bf16.mxu0 %v4581_v10  ;;  %1395 = vmatprep.subr.bf16.mxu1 %v4583_v13  ;;  %v5181_v10 = vld [vmem:[#allocation7 + $0x2c4] ss:$16 sps:$4 sm:$0xff]  }
 0x10a   : > { %v5184_v13 = vld [vmem:[#allocation7 + $0xa4] ss:$16 sps:$4 sm:$0xff]  }
 0x10b   : > { %v5256_v60 = vld [vmem:[#allocation7 + $0x124] ss:$16 sps:$4 sm:$0xff]  }
 0x10c   : > { %1353 = vmatpush2.bf16.msra.mxu0 %v4580_v14  ;;  %1396 = vmatpush2.bf16.msra.mxu1 %v4582_v17  ;;  %v5187_v14 = vld [vmem:[#allocation7 + $0x2a4] ss:$16 sps:$4 sm:$0xff]  }
 0x10d   : > { %1354 = vmatprep.subr.bf16.mxu0 %v4573_v18  ;;  %1397 = vmatprep.subr.bf16.mxu1 %v4575_v21  ;;  %v5190_v17 = vld [vmem:[#allocation7 + $0x84] ss:$16 sps:$4 sm:$0xff]  }
 0x10e   : > { %v5193_v18 = vld [vmem:[#allocation7 + $0x284] ss:$16 sps:$4 sm:$0xff]  }
 0x10f   : > { %v5196_v21 = vld [vmem:[#allocation7 + $0x64] ss:$16 sps:$4 sm:$0xff]  }
 0x110   : > { %1355 = vmatpush2.bf16.msra.mxu0 %v4572_v22  ;;  %1398 = vmatpush2.bf16.msra.mxu1 %v4574_v25  ;;  %v5199_v22 = vld [vmem:[#allocation7 + $0x264] ss:$16 sps:$4 sm:$0xff]  }
 0x111   : > { %1356 = vmatprep.subr.bf16.mxu0 %v4565_v26  ;;  %1399 = vmatprep.subr.bf16.mxu1 %v4567_v29  ;;  %v5205_v25 = vld [vmem:[#allocation7 + $0x244] ss:$16 sps:$4 sm:$0xff]   ;;  %v5200_v26 = vld [vmem:[#allocation7 + $0x40] ss:$16 sps:$4 sm:$0xff]  }
 0x112   : > { %v5211_v29 = vld [vmem:[#allocation7 + $0x224] ss:$16 sps:$4 sm:$0xff]  }
 0x114   : > { %1357 = vmatpush2.bf16.msra.mxu0 %v4564_v30  ;;  %1400 = vmatpush2.bf16.msra.mxu1 %v4566_v33  ;;  %v5206_v30 = vld [vmem:[#allocation7 + $0x20] ss:$16 sps:$4 sm:$0xff]   ;;  %v5217_v33 = vld [vmem:[#allocation7 + $0x204] ss:$16 sps:$4 sm:$0xff]  }
 0x115   : > { %1358 = vmatprep.subr.bf16.mxu0 %v4557_v34  ;;  %1401 = vmatprep.subr.bf16.mxu1 %v4559_v37  ;;  %v5212_v34 = vld [vmem:[#allocation7] ss:$16 sps:$4 sm:$0xff]   ;;  %v5223_v37 = vld [vmem:[#allocation7 + $0x3e4] ss:$16 sps:$4 sm:$0xff]  }
 0x118   : > { %1359 = vmatpush2.bf16.msra.mxu0 %v4556_v38  ;;  %1402 = vmatpush2.bf16.msra.mxu1 %v4558_v56  ;;  %v5218_v38 = vld [vmem:[#allocation7 + $0x1e0] ss:$16 sps:$4 sm:$0xff]   ;;  %v5229_v56 = vld [vmem:[#allocation7 + $0x3c4] ss:$16 sps:$4 sm:$0xff]  }
 0x119   : > { %1360 = vmatprep.subr.bf16.mxu0 %v4549_v41  ;;  %1403 = vmatprep.subr.bf16.mxu1 %v4551_v44  ;;  %v5224_v41 = vld [vmem:[#allocation7 + $0x1c0] ss:$16 sps:$4 sm:$0xff]   ;;  %v5235_v44 = vld [vmem:[#allocation7 + $0x3a4] ss:$16 sps:$4 sm:$0xff]  }
 0x11c   : > { %1361 = vmatpush2.bf16.msra.mxu0 %v4548_v45  ;;  %1404 = vmatpush2.bf16.msra.mxu1 %v4550_v48  ;;  %v5230_v45 = vld [vmem:[#allocation7 + $0x1a0] ss:$16 sps:$4 sm:$0xff]   ;;  %v5241_v48 = vld [vmem:[#allocation7 + $0x384] ss:$16 sps:$4 sm:$0xff]  }
 0x11d   : > { %1362 = vmatprep.subr.bf16.mxu0 %v4541_v49  ;;  %1405 = vmatprep.subr.bf16.mxu1 %v4543_v52  ;;  %v5236_v49 = vld [vmem:[#allocation7 + $0x180] ss:$16 sps:$4 sm:$0xff]   ;;  %v5247_v52 = vld [vmem:[#allocation7 + $0x364] ss:$16 sps:$4 sm:$0xff]  }
 0x120   : > { %1363 = vmatpush2.bf16.msra.mxu0 %v4540_v53  ;;  %1406 = vmatpush2.bf16.msra.mxu1 %v4542_v57  ;;  %v5242_v53 = vld [vmem:[#allocation7 + $0x160] ss:$16 sps:$4 sm:$0xff]   ;;  %v5253_v57 = vld [vmem:[#allocation7 + $0x344] ss:$16 sps:$4 sm:$0xff]  }
 0x121   : > { %1364 = vmatprep.subr.bf16.mxu0 %v4533_v58  ;;  %1407 = vmatprep.subr.bf16.mxu1 %v4535_v61  ;;  %v5248_v58 = vld [vmem:[#allocation7 + $0x140] ss:$16 sps:$4 sm:$0xff]   ;;  %v5259_v61 = vld [vmem:[#allocation7 + $0x324] ss:$16 sps:$4 sm:$0xff]  }
 0x124   : > { %1365 = vmatpush2.bf16.msra.mxu0 %v4532_v62  ;;  %1408 = vmatpush2.bf16.msra.mxu1 %v4534_v63  ;;  %v5254_v62 = vld [vmem:[#allocation7 + $0x120] ss:$16 sps:$4 sm:$0xff]  }
 0x125   : > { %1366 = vmatprep.subr.bf16.mxu0 %v4525_v0  ;;  %1409 = vmatprep.subr.bf16.mxu1 %v4527_v1  ;;  %v5257_v63 = vld [vmem:[#allocation7 + $0x320] ss:$16 sps:$4 sm:$0xff]   ;;  %v5262_v0 = vld [vmem:[#allocation7 + $0x104] ss:$16 sps:$4 sm:$0xff]  }
 0x126   : > { %v5265_v1 = vld [vmem:[#allocation7 + $0x304] ss:$16 sps:$4 sm:$0xff]  }
 0x128   : > { %1367 = vmatpush2.bf16.msra.mxu0 %v4524_v3  ;;  %1410 = vmatpush2.bf16.msra.mxu1 %v4526_v5  ;;  %v5263_v3 = vld [vmem:[#allocation7 + $0x300] ss:$16 sps:$4 sm:$0xff]   ;;  %v5271_v5 = vld [vmem:[#allocation7 + $0x6e4] ss:$16 sps:$4 sm:$0xff]  }
 0x129   : > { %3004 = vmatprep.subr.bf16.mxu0 %v5172_v2  ;;  %3047 = vmatprep.subr.bf16.mxu1 %v5175_v4  ;;  %v5260_v2 = vld [vmem:[#allocation7 + $0x100] ss:$16 sps:$4 sm:$0xff]   ;;  %v5268_v4 = vld [vmem:[#allocation7 + $0x4e4] ss:$16 sps:$4 sm:$0xff]  }
 0x12b   : > { %1369 = vmatmul.mubr.bf16.vlgmr.msra.gmra.mxu0 %v6257_v6  ;;  %1412 = vmatmul.mubr.bf16.vlgmr.msra.gmra.mxu1 %v6257_v6  ;;  %v5194_v6 = vld [vmem:[#allocation7 + $0x60] ss:$16 sps:$4 sm:$0xff]  }
 0x12c   : > { %3005 = vmatpush1.bf16.msra.mxu0 %v5170_v7  ;;  %3048 = vmatpush1.bf16.msra.mxu1 %v5173_v8  ;;  %v560_v7 = vlaneseq }
 0x12d   : > { %3006 = vmatprep.subr.bf16.mxu0 %v5178_v9  ;;  %3049 = vmatprep.subr.bf16.mxu1 %v5181_v10 }
 0x12e   : > { %v6265_v8 = vshrl.u32 %v560_v7, 7  ;;  %v5305_v7 = vld [vmem:[#allocation7 + $0x620] ss:$16 sps:$4 sm:$0xff]  }
 0x130   : > { %3007 = vmatpush1.bf16.msra.mxu0 %v5176_v11  ;;  %3050 = vmatpush1.bf16.msra.mxu1 %v5179_v12  ;;  %v6268_v9 = vsub.s32 1, %v6265_v8  ;;  %v6271_v10 = vsub.s32 0, %v6265_v8  ;;  %v574_v11 = vsub.s32 3, %v6265_v8  ;;  %v6274_v12 = vld [vmem:[#allocation14] sm:$0xff] }
 0x131   : > { %3008 = vmatprep.subr.bf16.mxu0 %v5184_v13  ;;  %3051 = vmatprep.subr.bf16.mxu1 %v5187_v14  ;;  %v570_v13 = vsub.s32 2, %v6265_v8 }
 0x134   : > { %3009 = vmatpush1.bf16.msra.mxu0 %v5182_v15  ;;  %3052 = vmatpush1.bf16.msra.mxu1 %v5185_v16  ;;  %v567_v16 = vrot.slane %v6274_v12, %v6268_v9 }
 0x135   : > { %3010 = vmatprep.subr.bf16.mxu0 %v5190_v17  ;;  %3053 = vmatprep.subr.bf16.mxu1 %v5193_v18  ;;  %v563_v17 = vrot.slane %v6274_v12, %v6271_v10 }
 0x138   : > { %3011 = vmatpush1.bf16.msra.mxu0 %v5188_v19  ;;  %3054 = vmatpush1.bf16.msra.mxu1 %v5191_v20  ;;  %v575_v19 = vrot.slane %v6274_v12, %v574_v11  ;;  %v571_v20 = vrot.slane %v6274_v12, %v570_v13 }
 0x139   : > { %3012 = vmatprep.subr.bf16.mxu0 %v5196_v21  ;;  %3055 = vmatprep.subr.bf16.mxu1 %v5199_v22 }
 0x13c   : > { %3013 = vmatpush1.bf16.msra.mxu0 %v5194_v6  ;;  %3056 = vmatpush1.bf16.msra.mxu1 %v5197_v23 }
 0x13d   : > { %3014 = vmatprep.subr.bf16.mxu0 %v5202_v24  ;;  %3057 = vmatprep.subr.bf16.mxu1 %v5205_v25 }
 0x140   : > { %3015 = vmatpush1.bf16.msra.mxu0 %v5200_v26  ;;  %3058 = vmatpush1.bf16.msra.mxu1 %v5203_v27 }
 0x141   : > { %3016 = vmatprep.subr.bf16.mxu0 %v5208_v28  ;;  %3059 = vmatprep.subr.bf16.mxu1 %v5211_v29 }
 0x144   : > { %3017 = vmatpush1.bf16.msra.mxu0 %v5206_v30  ;;  %3060 = vmatpush1.bf16.msra.mxu1 %v5209_v31 }
 0x145   : > { %3018 = vmatprep.subr.bf16.mxu0 %v5214_v32  ;;  %3061 = vmatprep.subr.bf16.mxu1 %v5217_v33 }
 0x148   : > { %3019 = vmatpush1.bf16.msra.mxu0 %v5212_v34  ;;  %3062 = vmatpush1.bf16.msra.mxu1 %v5215_v35 }
 0x149   : > { %3020 = vmatprep.subr.bf16.mxu0 %v5220_v36  ;;  %3063 = vmatprep.subr.bf16.mxu1 %v5223_v37 }
 0x14c   : > { %3021 = vmatpush2.bf16.msra.mxu0 %v5218_v38  ;;  %3064 = vmatpush2.bf16.msra.mxu1 %v5221_v39 }
 0x14d   : > { %3022 = vmatprep.subr.bf16.mxu0 %v5226_v40  ;;  %3065 = vmatprep.subr.bf16.mxu1 %v5229_v56 }
 0x150   : > { %3023 = vmatpush2.bf16.msra.mxu0 %v5224_v41  ;;  %3066 = vmatpush2.bf16.msra.mxu1 %v5227_v42  ;;  %v5266_v41 = vld [vmem:[#allocation7 + $0x4e0] ss:$16 sps:$4 sm:$0xff]  }
 0x151   : > { %3024 = vmatprep.subr.bf16.mxu0 %v5232_v43  ;;  %3067 = vmatprep.subr.bf16.mxu1 %v5235_v44  ;;  %v5269_v44 = vld [vmem:[#allocation7 + $0x6e0] ss:$16 sps:$4 sm:$0xff]  }
 0x154   : > { %3025 = vmatpush2.bf16.msra.mxu0 %v5230_v45  ;;  %3068 = vmatpush2.bf16.msra.mxu1 %v5233_v46  ;;  %v5274_v45 = vld [vmem:[#allocation7 + $0x4c4] ss:$16 sps:$4 sm:$0xff]  }
 0x155   : > { %3026 = vmatprep.subr.bf16.mxu0 %v5238_v47  ;;  %3069 = vmatprep.subr.bf16.mxu1 %v5241_v48  ;;  %v5277_v47 = vld [vmem:[#allocation7 + $0x6c4] ss:$16 sps:$4 sm:$0xff]   ;;  %v5272_v48 = vld [vmem:[#allocation7 + $0x4c0] ss:$16 sps:$4 sm:$0xff]  }
 0x158   : > { %3027 = vmatpush2.bf16.msra.mxu0 %v5236_v49  ;;  %3070 = vmatpush2.bf16.msra.mxu1 %v5239_v50  ;;  %v5275_v49 = vld [vmem:[#allocation7 + $0x6c0] ss:$16 sps:$4 sm:$0xff]   ;;  %v5280_v50 = vld [vmem:[#allocation7 + $0x4a4] ss:$16 sps:$4 sm:$0xff]  }
 0x159   : > { %3028 = vmatprep.subr.bf16.mxu0 %v5244_v51  ;;  %3071 = vmatprep.subr.bf16.mxu1 %v5247_v52  ;;  %v5283_v51 = vld [vmem:[#allocation7 + $0x6a4] ss:$16 sps:$4 sm:$0xff]   ;;  %v5278_v52 = vld [vmem:[#allocation7 + $0x4a0] ss:$16 sps:$4 sm:$0xff]  }
 0x15c   : > { %3029 = vmatpush2.bf16.msra.mxu0 %v5242_v53  ;;  %3072 = vmatpush2.bf16.msra.mxu1 %v5245_v54  ;;  %v5281_v53 = vld [vmem:[#allocation7 + $0x6a0] ss:$16 sps:$4 sm:$0xff]   ;;  %v5286_v54 = vld [vmem:[#allocation7 + $0x484] ss:$16 sps:$4 sm:$0xff]  }
 0x15d   : > { %3030 = vmatprep.subr.bf16.mxu0 %v5250_v55  ;;  %3073 = vmatprep.subr.bf16.mxu1 %v5253_v57  ;;  %v5289_v55 = vld [vmem:[#allocation7 + $0x684] ss:$16 sps:$4 sm:$0xff]   ;;  %v5284_v57 = vld [vmem:[#allocation7 + $0x480] ss:$16 sps:$4 sm:$0xff]  }
 0x160   : > { %3031 = vmatpush2.bf16.msra.mxu0 %v5248_v58  ;;  %3074 = vmatpush2.bf16.msra.mxu1 %v5251_v59  ;;  %v5287_v58 = vld [vmem:[#allocation7 + $0x680] ss:$16 sps:$4 sm:$0xff]   ;;  %v5292_v59 = vld [vmem:[#allocation7 + $0x464] ss:$16 sps:$4 sm:$0xff]  }
 0x161   : > { %3032 = vmatprep.subr.bf16.mxu0 %v5256_v60  ;;  %3075 = vmatprep.subr.bf16.mxu1 %v5259_v61  ;;  %v5295_v60 = vld [vmem:[#allocation7 + $0x664] ss:$16 sps:$4 sm:$0xff]   ;;  %v5290_v61 = vld [vmem:[#allocation7 + $0x460] ss:$16 sps:$4 sm:$0xff]  }
 0x164   : > { %3033 = vmatpush2.bf16.msra.mxu0 %v5254_v62  ;;  %3076 = vmatpush2.bf16.msra.mxu1 %v5257_v63  ;;  %v5293_v62 = vld [vmem:[#allocation7 + $0x660] ss:$16 sps:$4 sm:$0xff]   ;;  %v5298_v63 = vld [vmem:[#allocation7 + $0x444] ss:$16 sps:$4 sm:$0xff]  }
 0x165   : > { %3034 = vmatprep.subr.bf16.mxu0 %v5262_v0  ;;  %3077 = vmatprep.subr.bf16.mxu1 %v5265_v1  ;;  %v5301_v0 = vld [vmem:[#allocation7 + $0x644] ss:$16 sps:$4 sm:$0xff]   ;;  %v5296_v1 = vld [vmem:[#allocation7 + $0x440] ss:$16 sps:$4 sm:$0xff]  }
 0x168   : > { %3035 = vmatpush2.bf16.msra.mxu0 %v5260_v2  ;;  %3078 = vmatpush2.bf16.msra.mxu1 %v5263_v3  ;;  %v5299_v2 = vld [vmem:[#allocation7 + $0x640] ss:$16 sps:$4 sm:$0xff]   ;;  %v5304_v3 = vld [vmem:[#allocation7 + $0x424] ss:$16 sps:$4 sm:$0xff]  }
 0x169   : > { %3090 = vmatprep.subr.bf16.mxu0 %v5268_v4  ;;  %3133 = vmatprep.subr.bf16.mxu1 %v5271_v5  ;;  %v5307_v4 = vld [vmem:[#allocation7 + $0x624] ss:$16 sps:$4 sm:$0xff]   ;;  %v5302_v5 = vld [vmem:[#allocation7 + $0x420] ss:$16 sps:$4 sm:$0xff]  }
 0x1ab   : > { %v1284_v14 = vpop.f32.mrf.mxu0  ;;  %v1327_v15 = vpop.f32.mrf.mxu1 }
 0x1ac   : > { %v1285_v25 = vadd.f32 %v1284_v14, %v563_v17  ;;  %v1328_v29 = vadd.f32 %v1327_v15, %v571_v20  ;;  %v5310_v14 = vld [vmem:[#allocation7 + $0x404] ss:$16 sps:$4 sm:$0xff]  }
 0x1ad   : > { %v1286_v18 = vpop.f32.mrf.mxu0  ;;  %v1329_v21 = vpop.f32.mrf.mxu1  ;;  %v5313_v15 = vld [vmem:[#allocation7 + $0x604] ss:$16 sps:$4 sm:$0xff]  }
 0x1ae   : > { %v1287_v6 = vadd.f32 %v1286_v18, %v567_v16  ;;  %v1330_v26 = vadd.f32 %v1329_v21, %v575_v19  ;;  %v1422_v37 = vmax.f32 %v1285_v25, 0.0  ;;  %v1424_v40 = vmax.f32 %v1328_v29, 0.0  ;;  %v5316_v18 = vld [vmem:[#allocation7 + $0x5e4] ss:$16 sps:$4 sm:$0xff]   ;;  %v5317_v21 = vld [vmem:[#allocation7 + $0x7e0] ss:$16 sps:$4 sm:$0xff]  }
 0x1af   : > { %v1288_v22 = vpop.f32.mrf.mxu0  ;;  %v1331_v24 = vpop.f32.mrf.mxu1  ;;  %v5328_v25 = vld [vmem:[#allocation7 + $0x5a4] ss:$16 sps:$4 sm:$0xff]  }
 0x1b0   : > { %v1289_v23 = vadd.f32 %v1288_v22, %v563_v17  ;;  %v1332_v27 = vadd.f32 %v1331_v24, %v571_v20  ;;  %v1423_v34 = vmax.f32 %v1287_v6, 0.0  ;;  %v1425_v38 = vmax.f32 %v1330_v26, 0.0  ;;  %v5311_v17 = vld [vmem:[#allocation7 + $0x600] ss:$16 sps:$4 sm:$0xff]   ;;  %v5322_v22 = vld [vmem:[#allocation7 + $0x5c4] ss:$16 sps:$4 sm:$0xff]  }
 0x1b1   : > { %v1290_v28 = vpop.f32.mrf.mxu0  ;;  %v1333_v31 = vpop.f32.mrf.mxu1  ;;  %v5314_v20 = vld [vmem:[#allocation7 + $0x5e0] ss:$16 sps:$4 sm:$0xff]   ;;  %v5325_v6 = vld [vmem:[#allocation7 + $0x7c4] ss:$16 sps:$4 sm:$0xff]  }
 0x1b2   : > { %v1291_v30 = vadd.f32 %v1290_v28, %v567_v16  ;;  %v1430_v32 = vmax.f32 %v1289_v23, 0.0  ;;  %v1334_v33 = vadd.f32 %v1333_v31, %v575_v19  ;;  %v1432_v35 = vmax.f32 %v1332_v27, 0.0  ;;  %v5308_v16 = vld [vmem:[#allocation7 + $0x400] ss:$16 sps:$4 sm:$0xff]   ;;  %v5319_v19 = vld [vmem:[#allocation7 + $0x7e4] ss:$16 sps:$4 sm:$0xff]  }
 0x1b3   : > { %v5320_v23 = vld [vmem:[#allocation7 + $0x5c0] ss:$16 sps:$4 sm:$0xff]   ;;  %v5331_v26 = vld [vmem:[#allocation7 + $0x7a4] ss:$16 sps:$4 sm:$0xff]  }
 0x1b4   : > { %v1431_v36 = vmax.f32 %v1291_v30, 0.0  ;;  %v1433_v39 = vmax.f32 %v1334_v33, 0.0  ;;  %v6289_v42 = vpack.c.bf16 %v1430_v32, %v1422_v37  ;;  %v6293_v46 = vpack.c.bf16 %v1432_v35, %v1424_v40  ;;  %v5323_v24 = vld [vmem:[#allocation7 + $0x7c0] ss:$16 sps:$4 sm:$0xff]   ;;  %v5334_v29 = vld [vmem:[#allocation7 + $0x584] ss:$16 sps:$4 sm:$0xff]  }
 0x1b5   : > { %v5326_v27 = vld [vmem:[#allocation7 + $0x5a0] ss:$16 sps:$4 sm:$0xff]   ;;  %v5337_v30 = vld [vmem:[#allocation7 + $0x784] ss:$16 sps:$4 sm:$0xff]   ;;  %v578_v40 = vsub.s32 4, %v6265_v8 }
 0x1b6   : > { %v6287_v56 = vpack.c.bf16 %v1431_v36, %v1423_v34  ;;  %v6291_v43 = vpack.c.bf16 %v1433_v39, %v1425_v38  ;;  %v5329_v28 = vld [vmem:[#allocation7 + $0x7a0] ss:$16 sps:$4 sm:$0xff]   ;;  %v5340_v33 = vld [vmem:[#allocation7 + $0x564] ss:$16 sps:$4 sm:$0xff]   ;;  %v582_v39 = vsub.s32 5, %v6265_v8 }
 0x1b7   : > { %v5332_v31 = vld [vmem:[#allocation7 + $0x580] ss:$16 sps:$4 sm:$0xff]   ;;  %v5343_v34 = vld [vmem:[#allocation7 + $0x764] ss:$16 sps:$4 sm:$0xff]  }
 0x1b8   : > { %3036 = vmatprep.mubr.bf16.mxu0 %v6287_v56  ;;  %3079 = vmatprep.mubr.bf16.mxu1 %v6291_v43  ;;  %v5335_v32 = vld [vmem:[#allocation7 + $0x780] ss:$16 sps:$4 sm:$0xff]   ;;  %v5346_v37 = vld [vmem:[#allocation7 + $0x544] ss:$16 sps:$4 sm:$0xff]  }
 0x1b9   : > { %3037 = vmatmul.mubr.bf16.vlgmr.msra.gmra.mxu0 %v6289_v42  ;;  %3080 = vmatmul.mubr.bf16.vlgmr.msra.gmra.mxu1 %v6293_v46  ;;  %v5338_v35 = vld [vmem:[#allocation7 + $0x560] ss:$16 sps:$4 sm:$0xff]   ;;  %v5349_v38 = vld [vmem:[#allocation7 + $0x744] ss:$16 sps:$4 sm:$0xff]  }
 0x1ba   : > { %3091 = vmatpush1.bf16.msra.mxu0 %v5266_v41  ;;  %3134 = vmatpush1.bf16.msra.mxu1 %v5269_v44  ;;  %v5341_v36 = vld [vmem:[#allocation7 + $0x760] ss:$16 sps:$4 sm:$0xff]   ;;  %v590_v41 = vsub.s32 7, %v6265_v8  ;;  %v586_v44 = vsub.s32 6, %v6265_v8 }
 0x1bb   : > { %3092 = vmatprep.subr.bf16.mxu0 %v5274_v45  ;;  %3135 = vmatprep.subr.bf16.mxu1 %v5277_v47  ;;  %v5344_v45 = vld [vmem:[#allocation7 + $0x540] ss:$16 sps:$4 sm:$0xff]  }
 0x1be   : > { %3093 = vmatpush1.bf16.msra.mxu0 %v5272_v48  ;;  %3136 = vmatpush1.bf16.msra.mxu1 %v5275_v49  ;;  %v5347_v48 = vld [vmem:[#allocation7 + $0x740] ss:$16 sps:$4 sm:$0xff]   ;;  %v5352_v49 = vld [vmem:[#allocation7 + $0x524] ss:$16 sps:$4 sm:$0xff]  }
 0x1bf   : > { %3094 = vmatprep.subr.bf16.mxu0 %v5280_v50  ;;  %3137 = vmatprep.subr.bf16.mxu1 %v5283_v51  ;;  %v583_v51 = vrot.slane %v6274_v12, %v582_v39  ;;  %v5379_v39 = vld [vmem:[#allocation7 + $0x2ac] ss:$16 sps:$4 sm:$0xff]  }
 0x1c2   : > { %3095 = vmatpush1.bf16.msra.mxu0 %v5278_v52  ;;  %3138 = vmatpush1.bf16.msra.mxu1 %v5281_v53  ;;  %v5355_v52 = vld [vmem:[#allocation7 + $0x724] ss:$16 sps:$4 sm:$0xff]   ;;  %v579_v53 = vrot.slane %v6274_v12, %v578_v40  ;;  %v5374_v40 = vld [vmem:[#allocation7 + $0xa8] ss:$16 sps:$4 sm:$0xff]  }
 0x1c3   : > { %3096 = vmatprep.subr.bf16.mxu0 %v5286_v54  ;;  %3139 = vmatprep.subr.bf16.mxu1 %v5289_v55  ;;  %v591_v55 = vrot.slane %v6274_v12, %v590_v41  ;;  %v5377_v41 = vld [vmem:[#allocation7 + $0x2a8] ss:$16 sps:$4 sm:$0xff]  }
 0x1c6   : > { %3097 = vmatpush1.bf16.msra.mxu0 %v5284_v57  ;;  %3140 = vmatpush1.bf16.msra.mxu1 %v5287_v58  ;;  %v587_v57 = vrot.slane %v6274_v12, %v586_v44  ;;  %v5382_v44 = vld [vmem:[#allocation7 + $0x8c] ss:$16 sps:$4 sm:$0xff]  }
 0x1c7   : > { %3098 = vmatprep.subr.bf16.mxu0 %v5292_v59  ;;  %3141 = vmatprep.subr.bf16.mxu1 %v5295_v60  ;;  %v5350_v59 = vld [vmem:[#allocation7 + $0x520] ss:$16 sps:$4 sm:$0xff]  }
 0x1ca   : > { %3099 = vmatpush1.bf16.msra.mxu0 %v5290_v61  ;;  %3142 = vmatpush1.bf16.msra.mxu1 %v5293_v62  ;;  %v5353_v61 = vld [vmem:[#allocation7 + $0x720] ss:$16 sps:$4 sm:$0xff]   ;;  %v5358_v62 = vld [vmem:[#allocation7 + $0x504] ss:$16 sps:$4 sm:$0xff]  }
 0x1cb   : > { %3100 = vmatprep.subr.bf16.mxu0 %v5298_v63  ;;  %3143 = vmatprep.subr.bf16.mxu1 %v5301_v0 }
 0x1ce   : > { %3101 = vmatpush1.bf16.msra.mxu0 %v5296_v1  ;;  %3144 = vmatpush1.bf16.msra.mxu1 %v5299_v2  ;;  %v5361_v2 = vld [vmem:[#allocation7 + $0x704] ss:$16 sps:$4 sm:$0xff]  }
 0x1cf   : > { %3102 = vmatprep.subr.bf16.mxu0 %v5304_v3  ;;  %3145 = vmatprep.subr.bf16.mxu1 %v5307_v4 }
 0x1d2   : > { %3103 = vmatpush1.bf16.msra.mxu0 %v5302_v5  ;;  %3146 = vmatpush1.bf16.msra.mxu1 %v5305_v7 }
 0x1d3   : > { %3104 = vmatprep.subr.bf16.mxu0 %v5310_v14  ;;  %3147 = vmatprep.subr.bf16.mxu1 %v5313_v15 }
 0x1d6   : > { %3105 = vmatpush1.bf16.msra.mxu0 %v5308_v16  ;;  %3148 = vmatpush1.bf16.msra.mxu1 %v5311_v17  ;;  %v5356_v16 = vld [vmem:[#allocation7 + $0x500] ss:$16 sps:$4 sm:$0xff]  }
 0x1d7   : > { %3106 = vmatprep.subr.bf16.mxu0 %v5316_v18  ;;  %3149 = vmatprep.subr.bf16.mxu1 %v5319_v19  ;;  %v5359_v19 = vld [vmem:[#allocation7 + $0x700] ss:$16 sps:$4 sm:$0xff]  }
 0x1da   : > { %3107 = vmatpush2.bf16.msra.mxu0 %v5314_v20  ;;  %3150 = vmatpush2.bf16.msra.mxu1 %v5317_v21  ;;  %v5364_v20 = vld [vmem:[#allocation7 + $0xec] ss:$16 sps:$4 sm:$0xff]  }
 0x1db   : > { %3108 = vmatprep.subr.bf16.mxu0 %v5322_v22  ;;  %3151 = vmatprep.subr.bf16.mxu1 %v5325_v6 }
 0x1de   : > { %3109 = vmatpush2.bf16.msra.mxu0 %v5320_v23  ;;  %3152 = vmatpush2.bf16.msra.mxu1 %v5323_v24  ;;  %v5367_v23 = vld [vmem:[#allocation7 + $0x2ec] ss:$16 sps:$4 sm:$0xff]  }
 0x1df   : > { %3110 = vmatprep.subr.bf16.mxu0 %v5328_v25  ;;  %3153 = vmatprep.subr.bf16.mxu1 %v5331_v26 }
 0x1e2   : > { %3111 = vmatpush2.bf16.msra.mxu0 %v5326_v27  ;;  %3154 = vmatpush2.bf16.msra.mxu1 %v5329_v28 }
 0x1e3   : > { %3112 = vmatprep.subr.bf16.mxu0 %v5334_v29  ;;  %3155 = vmatprep.subr.bf16.mxu1 %v5337_v30  ;;  %v5362_v29 = vld [vmem:[#allocation7 + $0xe8] ss:$16 sps:$4 sm:$0xff]  }
 0x1e6   : > { %3113 = vmatpush2.bf16.msra.mxu0 %v5332_v31  ;;  %3156 = vmatpush2.bf16.msra.mxu1 %v5335_v32  ;;  %v5365_v32 = vld [vmem:[#allocation7 + $0x2e8] ss:$16 sps:$4 sm:$0xff]  }
 0x1e7   : > { %3114 = vmatprep.subr.bf16.mxu0 %v5340_v33  ;;  %3157 = vmatprep.subr.bf16.mxu1 %v5343_v34  ;;  %v5370_v34 = vld [vmem:[#allocation7 + $0xcc] ss:$16 sps:$4 sm:$0xff]  }
 0x1ea   : > { %3115 = vmatpush2.bf16.msra.mxu0 %v5338_v35  ;;  %3158 = vmatpush2.bf16.msra.mxu1 %v5341_v36  ;;  %v5373_v35 = vld [vmem:[#allocation7 + $0x2cc] ss:$16 sps:$4 sm:$0xff]   ;;  %v5368_v36 = vld [vmem:[#allocation7 + $0xc8] ss:$16 sps:$4 sm:$0xff]  }
 0x1eb   : > { %v1370_v47 = vpop.f32.mrf.mxu0  ;;  %3116 = vmatprep.subr.bf16.mxu0 %v5346_v37  ;;  %v1413_v50 = vpop.f32.mrf.mxu1  ;;  %3159 = vmatprep.subr.bf16.mxu1 %v5349_v38  ;;  %v5371_v37 = vld [vmem:[#allocation7 + $0x2c8] ss:$16 sps:$4 sm:$0xff]   ;;  %v5376_v38 = vld [vmem:[#allocation7 + $0xac] ss:$16 sps:$4 sm:$0xff]  }
 0x1ec   : > { %v1371_v3 = vadd.f32 %v1370_v47, %v579_v53  ;;  %v1414_v14 = vadd.f32 %v1413_v50, %v587_v57  ;;  %v5380_v47 = vld [vmem:[#allocation7 + $0x88] ss:$16 sps:$4 sm:$0xff]  }
 0x1ed   : > { %v1372_v54 = vpop.f32.mrf.mxu0  ;;  %v1415_v58 = vpop.f32.mrf.mxu1  ;;  %v5389_v50 = vld [vmem:[#allocation7 + $0x268] ss:$16 sps:$4 sm:$0xff]  }
 0x1ee   : > { %3117 = vmatpush2.bf16.msra.mxu0 %v5344_v45  ;;  %3160 = vmatpush2.bf16.msra.mxu1 %v5347_v48  ;;  %v1373_v63 = vadd.f32 %v1372_v54, %v583_v51  ;;  %v1416_v4 = vadd.f32 %v1415_v58, %v591_v55  ;;  %v1426_v24 = vmax.f32 %v1371_v3, 0.0  ;;  %v1428_v27 = vmax.f32 %v1414_v14, 0.0  ;;  %v5385_v45 = vld [vmem:[#allocation7 + $0x28c] ss:$16 sps:$4 sm:$0xff]   ;;  %v5395_v54 = vld [vmem:[#allocation7 + $0x248] ss:$16 sps:$4 sm:$0xff]  }
 0x1ef   : > { %v1374_v60 = vpop.f32.mrf.mxu0  ;;  %3118 = vmatprep.subr.bf16.mxu0 %v5352_v49  ;;  %v1417_v1 = vpop.f32.mrf.mxu1  ;;  %3161 = vmatprep.subr.bf16.mxu1 %v5355_v52  ;;  %v5388_v48 = vld [vmem:[#allocation7 + $0x6c] ss:$16 sps:$4 sm:$0xff]   ;;  %v5398_v58 = vld [vmem:[#allocation7 + $0x28] ss:$16 sps:$4 sm:$0xff]  }
 0x1f0   : > { %v1375_v0 = vadd.f32 %v1374_v60, %v579_v53  ;;  %v1418_v5 = vadd.f32 %v1417_v1, %v587_v57  ;;  %v1427_v21 = vmax.f32 %v1373_v63, 0.0  ;;  %v1429_v25 = vmax.f32 %v1416_v4, 0.0  ;;  %v5391_v49 = vld [vmem:[#allocation7 + $0x26c] ss:$16 sps:$4 sm:$0xff]   ;;  %v5392_v53 = vld [vmem:[#allocation7 + $0x48] ss:$16 sps:$4 sm:$0xff]  }
 0x1f1   : > { %v1376_v7 = vpop.f32.mrf.mxu0  ;;  %v1419_v12 = vpop.f32.mrf.mxu1  ;;  %v5397_v52 = vld [vmem:[#allocation7 + $0x24c] ss:$16 sps:$4 sm:$0xff]   ;;  %v5407_v63 = vld [vmem:[#allocation7 + $0x208] ss:$16 sps:$4 sm:$0xff]  }
 0x1f2   : > { %v1377_v15 = vadd.f32 %v1376_v7, %v583_v51  ;;  %3119 = vmatpush2.bf16.msra.mxu0 %v5350_v59  ;;  %v1434_v17 = vmax.f32 %v1375_v0, 0.0  ;;  %v1420_v18 = vadd.f32 %v1419_v12, %v591_v55  ;;  %3162 = vmatpush2.bf16.msra.mxu1 %v5353_v61  ;;  %v1436_v22 = vmax.f32 %v1418_v5, 0.0  ;;  %v5394_v51 = vld [vmem:[#allocation7 + $0x4c] ss:$16 sps:$4 sm:$0xff]   ;;  %v5401_v59 = vld [vmem:[#allocation7 + $0x228] ss:$16 sps:$4 sm:$0xff]  }
 0x1f3   : > { %3120 = vmatprep.subr.bf16.mxu0 %v5358_v62  ;;  %3163 = vmatprep.subr.bf16.mxu1 %v5361_v2  ;;  %v5400_v55 = vld [vmem:[#allocation7 + $0x2c] ss:$16 sps:$4 sm:$0xff]   ;;  %v5404_v62 = vld [vmem:[#allocation7 + $0x8] ss:$16 sps:$4 sm:$0xff]  }
 0x1f4   : > { %v1435_v6 = vmax.f32 %v1377_v15, 0.0  ;;  %v1437_v26 = vmax.f32 %v1420_v18, 0.0  ;;  %v6309_v30 = vpack.c.bf16 %v1434_v17, %v1426_v24  ;;  %v6313_v33 = vpack.c.bf16 %v1436_v22, %v1428_v27  ;;  %v5403_v57 = vld [vmem:[#allocation7 + $0x22c] ss:$16 sps:$4 sm:$0xff]   ;;  %v5410_v2 = vld [vmem:[#allocation7 + $0x1e8] ss:$16 sps:$4 sm:$0xff]  }
 0x1f5   : > { %v5406_v60 = vld [vmem:[#allocation7 + $0xc] ss:$16 sps:$4 sm:$0xff]   ;;  %v5413_v3 = vld [vmem:[#allocation7 + $0x3e8] ss:$16 sps:$4 sm:$0xff]  }
 0x1f6   : > { %v6307_v28 = vpack.c.bf16 %v1435_v6, %v1427_v21  ;;  %3121 = vmatpush2.bf16.msra.mxu0 %v5356_v16  ;;  %v6311_v31 = vpack.c.bf16 %v1437_v26, %v1429_v25  ;;  %3164 = vmatpush2.bf16.msra.mxu1 %v5359_v19  ;;  %v5409_v61 = vld [vmem:[#allocation7 + $0x20c] ss:$16 sps:$4 sm:$0xff]   ;;  %v5416_v7 = vld [vmem:[#allocation7 + $0x1c8] ss:$16 sps:$4 sm:$0xff]  }
 0x1f7   : > { %3176 = vmatprep.subr.bf16.mxu0 %v5364_v20  ;;  %3219 = vmatprep.subr.bf16.mxu1 %v5367_v23  ;;  %v5412_v0 = vld [vmem:[#allocation7 + $0x1ec] ss:$16 sps:$4 sm:$0xff]   ;;  %v5419_v14 = vld [vmem:[#allocation7 + $0x3c8] ss:$16 sps:$4 sm:$0xff]  }
 0x1f8   : > { %3122 = vmatprep.mubr.bf16.mxu0 %v6307_v28  ;;  %3165 = vmatprep.mubr.bf16.mxu1 %v6311_v31  ;;  %v5415_v1 = vld [vmem:[#allocation7 + $0x3ec] ss:$16 sps:$4 sm:$0xff]   ;;  %v5422_v16 = vld [vmem:[#allocation7 + $0x1a8] ss:$16 sps:$4 sm:$0xff]  }
 0x1f9   : > { %3123 = vmatmul.mubr.bf16.vlgmr.msra.gmra.mxu0 %v6309_v30  ;;  %3166 = vmatmul.mubr.bf16.vlgmr.msra.gmra.mxu1 %v6313_v33  ;;  %v5418_v4 = vld [vmem:[#allocation7 + $0x1cc] ss:$16 sps:$4 sm:$0xff]   ;;  %v5425_v17 = vld [vmem:[#allocation7 + $0x3a8] ss:$16 sps:$4 sm:$0xff]  }
 0x1fa   : > { %3177 = vmatpush1.bf16.msra.mxu0 %v5362_v29  ;;  %3220 = vmatpush1.bf16.msra.mxu1 %v5365_v32  ;;  %v5421_v5 = vld [vmem:[#allocation7 + $0x3cc] ss:$16 sps:$4 sm:$0xff]   ;;  %v5428_v20 = vld [vmem:[#allocation7 + $0x188] ss:$16 sps:$4 sm:$0xff]  }
 0x1fb   : > { %3208 = vmatprep.mubr.bf16.mxu0 %v6287_v56  ;;  %3251 = vmatprep.mubr.bf16.mxu1 %v6291_v43  ;;  %v5383_v56 = vld [vmem:[#allocation7 + $0x288] ss:$16 sps:$4 sm:$0xff]   ;;  %v5424_v15 = vld [vmem:[#allocation7 + $0x1ac] ss:$16 sps:$4 sm:$0xff]  }
 0x1fc   : > { %3178 = vmatprep.subr.bf16.mxu0 %v5370_v34  ;;  %3221 = vmatprep.subr.bf16.mxu1 %v5373_v35  ;;  %v5386_v43 = vld [vmem:[#allocation7 + $0x68] ss:$16 sps:$4 sm:$0xff]   ;;  %v5427_v12 = vld [vmem:[#allocation7 + $0x3ac] ss:$16 sps:$4 sm:$0xff]  }
 0x1fd   : > { %v5430_v18 = vld [vmem:[#allocation7 + $0x18c] ss:$16 sps:$4 sm:$0xff]   ;;  %v5431_v21 = vld [vmem:[#allocation7 + $0x388] ss:$16 sps:$4 sm:$0xff]  }
 0x1fe   : > { %3179 = vmatpush1.bf16.msra.mxu0 %v5368_v36  ;;  %3222 = vmatpush1.bf16.msra.mxu1 %v5371_v37  ;;  %v5433_v19 = vld [vmem:[#allocation7 + $0x38c] ss:$16 sps:$4 sm:$0xff]   ;;  %v5434_v23 = vld [vmem:[#allocation7 + $0x168] ss:$16 sps:$4 sm:$0xff]  }
 0x1ff   : > { %3180 = vmatprep.subr.bf16.mxu0 %v5376_v38  ;;  %3223 = vmatprep.subr.bf16.mxu1 %v5379_v39  ;;  %v5436_v22 = vld [vmem:[#allocation7 + $0x16c] ss:$16 sps:$4 sm:$0xff]   ;;  %v5437_v24 = vld [vmem:[#allocation7 + $0x368] ss:$16 sps:$4 sm:$0xff]  }
 0x200   : > { %v5439_v6 = vld [vmem:[#allocation7 + $0x36c] ss:$16 sps:$4 sm:$0xff]   ;;  %v5440_v27 = vld [vmem:[#allocation7 + $0x148] ss:$16 sps:$4 sm:$0xff]  }
 0x201   : > { %v5442_v25 = vld [vmem:[#allocation7 + $0x14c] ss:$16 sps:$4 sm:$0xff]   ;;  %v5443_v29 = vld [vmem:[#allocation7 + $0x348] ss:$16 sps:$4 sm:$0xff]  }
 0x202   : > { %3181 = vmatpush1.bf16.msra.mxu0 %v5374_v40  ;;  %3224 = vmatpush1.bf16.msra.mxu1 %v5377_v41  ;;  %v5445_v26 = vld [vmem:[#allocation7 + $0x34c] ss:$16 sps:$4 sm:$0xff]   ;;  %v5446_v35 = vld [vmem:[#allocation7 + $0x128] ss:$16 sps:$4 sm:$0xff]  }
 0x203   : > { %3182 = vmatprep.subr.bf16.mxu0 %v5382_v44  ;;  %3225 = vmatprep.subr.bf16.mxu1 %v5385_v45  ;;  %v5448_v32 = vld [vmem:[#allocation7 + $0x12c] ss:$16 sps:$4 sm:$0xff]   ;;  %v5449_v36 = vld [vmem:[#allocation7 + $0x328] ss:$16 sps:$4 sm:$0xff]  }
 0x204   : > { %v5451_v34 = vld [vmem:[#allocation7 + $0x32c] ss:$16 sps:$4 sm:$0xff]   ;;  %v5452_v39 = vld [vmem:[#allocation7 + $0x108] ss:$16 sps:$4 sm:$0xff]  }
 0x205   : > { %v5454_v37 = vld [vmem:[#allocation7 + $0x10c] ss:$16 sps:$4 sm:$0xff]   ;;  %v5455_v40 = vld [vmem:[#allocation7 + $0x308] ss:$16 sps:$4 sm:$0xff]  }
 0x206   : > { %3183 = vmatpush1.bf16.msra.mxu0 %v5380_v47  ;;  %3226 = vmatpush1.bf16.msra.mxu1 %v5383_v56  ;;  %v5457_v38 = vld [vmem:[#allocation7 + $0x30c] ss:$16 sps:$4 sm:$0xff]   ;;  %v5458_v45 = vld [vmem:[#allocation7 + $0x4e8] ss:$16 sps:$4 sm:$0xff]  }
 0x207   : > { %3184 = vmatprep.subr.bf16.mxu0 %v5388_v48  ;;  %3227 = vmatprep.subr.bf16.mxu1 %v5391_v49  ;;  %v5460_v41 = vld [vmem:[#allocation7 + $0x4ec] ss:$16 sps:$4 sm:$0xff]   ;;  %v5461_v47 = vld [vmem:[#allocation7 + $0x6e8] ss:$16 sps:$4 sm:$0xff]  }
 0x208   : > { %v5463_v44 = vld [vmem:[#allocation7 + $0x6ec] ss:$16 sps:$4 sm:$0xff]   ;;  %v5464_v49 = vld [vmem:[#allocation7 + $0x4c8] ss:$16 sps:$4 sm:$0xff]  }
 0x209   : > { %v5466_v56 = vld [vmem:[#allocation7 + $0x4cc] ss:$16 sps:$4 sm:$0xff]  }
 0x20a   : > { %3185 = vmatpush1.bf16.msra.mxu0 %v5386_v43  ;;  %3228 = vmatpush1.bf16.msra.mxu1 %v5389_v50  ;;  %v5469_v48 = vld [vmem:[#allocation7 + $0x6cc] ss:$16 sps:$4 sm:$0xff]   ;;  %v5467_v43 = vld [vmem:[#allocation7 + $0x6c8] ss:$16 sps:$4 sm:$0xff]  }
 0x20b   : > { %3186 = vmatprep.subr.bf16.mxu0 %v5394_v51  ;;  %3229 = vmatprep.subr.bf16.mxu1 %v5397_v52  ;;  %v5472_v50 = vld [vmem:[#allocation7 + $0x4ac] ss:$16 sps:$4 sm:$0xff]   ;;  %v5470_v52 = vld [vmem:[#allocation7 + $0x4a8] ss:$16 sps:$4 sm:$0xff]  }
 0x20c   : > { %v5475_v51 = vld [vmem:[#allocation7 + $0x6ac] ss:$16 sps:$4 sm:$0xff]  }
 0x20e   : > { %3187 = vmatpush1.bf16.msra.mxu0 %v5392_v53  ;;  %3230 = vmatpush1.bf16.msra.mxu1 %v5395_v54  ;;  %v5478_v53 = vld [vmem:[#allocation7 + $0x48c] ss:$16 sps:$4 sm:$0xff]   ;;  %v5476_v54 = vld [vmem:[#allocation7 + $0x488] ss:$16 sps:$4 sm:$0xff]  }
 0x20f   : > { %3188 = vmatprep.subr.bf16.mxu0 %v5400_v55  ;;  %3231 = vmatprep.subr.bf16.mxu1 %v5403_v57  ;;  %v5484_v55 = vld [vmem:[#allocation7 + $0x46c] ss:$16 sps:$4 sm:$0xff]  }
 0x210   : > { %v5487_v57 = vld [vmem:[#allocation7 + $0x66c] ss:$16 sps:$4 sm:$0xff]  }
 0x212   : > { %3189 = vmatpush1.bf16.msra.mxu0 %v5398_v58  ;;  %3232 = vmatpush1.bf16.msra.mxu1 %v5401_v59  ;;  %v5485_v58 = vld [vmem:[#allocation7 + $0x668] ss:$16 sps:$4 sm:$0xff]   ;;  %v5490_v59 = vld [vmem:[#allocation7 + $0x44c] ss:$16 sps:$4 sm:$0xff]  }
 0x213   : > { %3190 = vmatprep.subr.bf16.mxu0 %v5406_v60  ;;  %3233 = vmatprep.subr.bf16.mxu1 %v5409_v61  ;;  %v5493_v60 = vld [vmem:[#allocation7 + $0x64c] ss:$16 sps:$4 sm:$0xff]   ;;  %v5488_v61 = vld [vmem:[#allocation7 + $0x448] ss:$16 sps:$4 sm:$0xff]  }
 0x216   : > { %3191 = vmatpush1.bf16.msra.mxu0 %v5404_v62  ;;  %3234 = vmatpush1.bf16.msra.mxu1 %v5407_v63  ;;  %v5491_v62 = vld [vmem:[#allocation7 + $0x648] ss:$16 sps:$4 sm:$0xff]   ;;  %v5496_v63 = vld [vmem:[#allocation7 + $0x42c] ss:$16 sps:$4 sm:$0xff]  }
 0x217   : > { %3192 = vmatprep.subr.bf16.mxu0 %v5412_v0  ;;  %3235 = vmatprep.subr.bf16.mxu1 %v5415_v1  ;;  %v5499_v0 = vld [vmem:[#allocation7 + $0x62c] ss:$16 sps:$4 sm:$0xff]   ;;  %v5494_v1 = vld [vmem:[#allocation7 + $0x428] ss:$16 sps:$4 sm:$0xff]  }
 0x21a   : > { %3193 = vmatpush2.bf16.msra.mxu0 %v5410_v2  ;;  %3236 = vmatpush2.bf16.msra.mxu1 %v5413_v3  ;;  %v5497_v2 = vld [vmem:[#allocation7 + $0x628] ss:$16 sps:$4 sm:$0xff]   ;;  %v5502_v3 = vld [vmem:[#allocation7 + $0x40c] ss:$16 sps:$4 sm:$0xff]  }
 0x21b   : > { %3194 = vmatprep.subr.bf16.mxu0 %v5418_v4  ;;  %3237 = vmatprep.subr.bf16.mxu1 %v5421_v5  ;;  %v5505_v4 = vld [vmem:[#allocation7 + $0x60c] ss:$16 sps:$4 sm:$0xff]   ;;  %v5500_v5 = vld [vmem:[#allocation7 + $0x408] ss:$16 sps:$4 sm:$0xff]  }
 0x21e   : > { %3195 = vmatpush2.bf16.msra.mxu0 %v5416_v7  ;;  %3238 = vmatpush2.bf16.msra.mxu1 %v5419_v14  ;;  %v5503_v7 = vld [vmem:[#allocation7 + $0x608] ss:$16 sps:$4 sm:$0xff]   ;;  %v5508_v14 = vld [vmem:[#allocation7 + $0x5ec] ss:$16 sps:$4 sm:$0xff]  }
 0x21f   : > { %3196 = vmatprep.subr.bf16.mxu0 %v5424_v15  ;;  %3239 = vmatprep.subr.bf16.mxu1 %v5427_v12  ;;  %v5511_v15 = vld [vmem:[#allocation7 + $0x7ec] ss:$16 sps:$4 sm:$0xff]   ;;  %v5506_v12 = vld [vmem:[#allocation7 + $0x5e8] ss:$16 sps:$4 sm:$0xff]  }
 0x222   : > { %3197 = vmatpush2.bf16.msra.mxu0 %v5422_v16  ;;  %3240 = vmatpush2.bf16.msra.mxu1 %v5425_v17  ;;  %v5509_v16 = vld [vmem:[#allocation7 + $0x7e8] ss:$16 sps:$4 sm:$0xff]   ;;  %v5514_v17 = vld [vmem:[#allocation7 + $0x5cc] ss:$16 sps:$4 sm:$0xff]  }
 0x223   : > { %3198 = vmatprep.subr.bf16.mxu0 %v5430_v18  ;;  %3241 = vmatprep.subr.bf16.mxu1 %v5433_v19  ;;  %v5517_v18 = vld [vmem:[#allocation7 + $0x7cc] ss:$16 sps:$4 sm:$0xff]   ;;  %v5512_v19 = vld [vmem:[#allocation7 + $0x5c8] ss:$16 sps:$4 sm:$0xff]  }
 0x226   : > { %3199 = vmatpush2.bf16.msra.mxu0 %v5428_v20  ;;  %3242 = vmatpush2.bf16.msra.mxu1 %v5431_v21  ;;  %v5515_v20 = vld [vmem:[#allocation7 + $0x7c8] ss:$16 sps:$4 sm:$0xff]   ;;  %v5520_v21 = vld [vmem:[#allocation7 + $0x5ac] ss:$16 sps:$4 sm:$0xff]  }
 0x227   : > { %3200 = vmatprep.subr.bf16.mxu0 %v5436_v22  ;;  %3243 = vmatprep.subr.bf16.mxu1 %v5439_v6  ;;  %v5523_v22 = vld [vmem:[#allocation7 + $0x7ac] ss:$16 sps:$4 sm:$0xff]   ;;  %v5518_v6 = vld [vmem:[#allocation7 + $0x5a8] ss:$16 sps:$4 sm:$0xff]  }
 0x22a   : > { %3201 = vmatpush2.bf16.msra.mxu0 %v5434_v23  ;;  %3244 = vmatpush2.bf16.msra.mxu1 %v5437_v24  ;;  %v5521_v23 = vld [vmem:[#allocation7 + $0x7a8] ss:$16 sps:$4 sm:$0xff]   ;;  %v5526_v24 = vld [vmem:[#allocation7 + $0x58c] ss:$16 sps:$4 sm:$0xff]  }
 0x22b   : > { %3202 = vmatprep.subr.bf16.mxu0 %v5442_v25  ;;  %3245 = vmatprep.subr.bf16.mxu1 %v5445_v26  ;;  %v5529_v25 = vld [vmem:[#allocation7 + $0x78c] ss:$16 sps:$4 sm:$0xff]   ;;  %v5524_v26 = vld [vmem:[#allocation7 + $0x588] ss:$16 sps:$4 sm:$0xff]  }
 0x22e   : > { %3203 = vmatpush2.bf16.msra.mxu0 %v5440_v27  ;;  %3246 = vmatpush2.bf16.msra.mxu1 %v5443_v29  ;;  %v5527_v27 = vld [vmem:[#allocation7 + $0x788] ss:$16 sps:$4 sm:$0xff]   ;;  %v5532_v29 = vld [vmem:[#allocation7 + $0x56c] ss:$16 sps:$4 sm:$0xff]  }
 0x22f   : > { %3204 = vmatprep.subr.bf16.mxu0 %v5448_v32  ;;  %3247 = vmatprep.subr.bf16.mxu1 %v5451_v34  ;;  %v5535_v32 = vld [vmem:[#allocation7 + $0x76c] ss:$16 sps:$4 sm:$0xff]   ;;  %v5530_v34 = vld [vmem:[#allocation7 + $0x568] ss:$16 sps:$4 sm:$0xff]  }
 0x232   : > { %3205 = vmatpush2.bf16.msra.mxu0 %v5446_v35  ;;  %3248 = vmatpush2.bf16.msra.mxu1 %v5449_v36  ;;  %v5533_v35 = vld [vmem:[#allocation7 + $0x768] ss:$16 sps:$4 sm:$0xff]   ;;  %v5538_v36 = vld [vmem:[#allocation7 + $0x54c] ss:$16 sps:$4 sm:$0xff]  }
 0x233   : > { %3206 = vmatprep.subr.bf16.mxu0 %v5454_v37  ;;  %3249 = vmatprep.subr.bf16.mxu1 %v5457_v38  ;;  %v5541_v37 = vld [vmem:[#allocation7 + $0x74c] ss:$16 sps:$4 sm:$0xff]   ;;  %v5536_v38 = vld [vmem:[#allocation7 + $0x548] ss:$16 sps:$4 sm:$0xff]  }
 0x236   : > { %3207 = vmatpush2.bf16.msra.mxu0 %v5452_v39  ;;  %3250 = vmatpush2.bf16.msra.mxu1 %v5455_v40  ;;  %v5539_v39 = vld [vmem:[#allocation7 + $0x748] ss:$16 sps:$4 sm:$0xff]   ;;  %v5544_v40 = vld [vmem:[#allocation7 + $0x52c] ss:$16 sps:$4 sm:$0xff]  }
 0x237   : > { %3262 = vmatprep.subr.bf16.mxu0 %v5460_v41  ;;  %3305 = vmatprep.subr.bf16.mxu1 %v5463_v44  ;;  %v5547_v41 = vld [vmem:[#allocation7 + $0x72c] ss:$16 sps:$4 sm:$0xff]   ;;  %v5542_v44 = vld [vmem:[#allocation7 + $0x528] ss:$16 sps:$4 sm:$0xff]  }
 0x239   : > { %3209 = vmatmul.mubr.bf16.vlgmr.msra.gmra.mxu0 %v6289_v42  ;;  %3252 = vmatmul.mubr.bf16.vlgmr.msra.gmra.mxu1 %v6293_v46  ;;  %v5473_v42 = vld [vmem:[#allocation7 + $0x6a8] ss:$16 sps:$4 sm:$0xff]   ;;  %v5481_v46 = vld [vmem:[#allocation7 + $0x68c] ss:$16 sps:$4 sm:$0xff]  }
 0x23a   : > { %3263 = vmatpush1.bf16.msra.mxu0 %v5458_v45  ;;  %3294 = vmatprep.mubr.bf16.mxu0 %v6307_v28  ;;  %v5479_v28 = vld [vmem:[#allocation7 + $0x688] ss:$16 sps:$4 sm:$0xff]  }
 0x23b   : > { %3306 = vmatpush1.bf16.msra.mxu1 %v5461_v47  ;;  %3337 = vmatprep.mubr.bf16.mxu1 %v6311_v31  ;;  %v5482_v31 = vld [vmem:[#allocation7 + $0x468] ss:$16 sps:$4 sm:$0xff]   ;;  %v5550_v47 = vld [vmem:[#allocation7 + $0x50c] ss:$16 sps:$4 sm:$0xff]  }
 0x23c   : > { %3264 = vmatprep.subr.bf16.mxu0 %v5466_v56  ;;  %3307 = vmatprep.subr.bf16.mxu1 %v5469_v48  ;;  %v5545_v45 = vld [vmem:[#allocation7 + $0x728] ss:$16 sps:$4 sm:$0xff]   ;;  %v5553_v56 = vld [vmem:[#allocation7 + $0x70c] ss:$16 sps:$4 sm:$0xff]  }
 0x23d   : > { %v5548_v48 = vld [vmem:[#allocation7 + $0x508] ss:$16 sps:$4 sm:$0xff]  }
 0x23e   : > { %3265 = vmatpush1.bf16.msra.mxu0 %v5464_v49  ;;  %v5551_v49 = vld [vmem:[#allocation7 + $0x708] ss:$16 sps:$4 sm:$0xff]  }
 0x23f   : > { %3308 = vmatpush1.bf16.msra.mxu1 %v5467_v43  ;;  %3266 = vmatprep.subr.bf16.mxu0 %v5472_v50  ;;  %v5556_v43 = vld [vmem:[#allocation8 + $0x74] ss:$8 sps:$4 sm:$0xff]   ;;  %v5554_v50 = vld [vmem:[#allocation8 + $0x70] ss:$8 sps:$4 sm:$0xff]  }
 0x240   : > { %3309 = vmatprep.subr.bf16.mxu1 %v5475_v51  ;;  %v5559_v51 = vld [vmem:[#allocation8 + $0x64] ss:$8 sps:$4 sm:$0xff]  }
 0x242   : > { %3267 = vmatpush1.bf16.msra.mxu0 %v5470_v52  ;;  %v5557_v52 = vld [vmem:[#allocation8 + $0x60] ss:$8 sps:$4 sm:$0xff]  }
 0x243   : > { %3310 = vmatpush1.bf16.msra.mxu1 %v5473_v42  ;;  %3268 = vmatprep.subr.bf16.mxu0 %v5478_v53  ;;  %v5562_v42 = vld [vmem:[#allocation8 + $0x54] ss:$8 sps:$4 sm:$0xff]   ;;  %v5560_v53 = vld [vmem:[#allocation8 + $0x50] ss:$8 sps:$4 sm:$0xff]  }
 0x244   : > { %3311 = vmatprep.subr.bf16.mxu1 %v5481_v46  ;;  %v5565_v46 = vld [vmem:[#allocation8 + $0x44] ss:$8 sps:$4 sm:$0xff]  }
 0x246   : > { %3269 = vmatpush1.bf16.msra.mxu0 %v5476_v54  ;;  %v5563_v54 = vld [vmem:[#allocation8 + $0x40] ss:$8 sps:$4 sm:$0xff]  }
 0x247   : > { %3312 = vmatpush1.bf16.msra.mxu1 %v5479_v28  ;;  %3270 = vmatprep.subr.bf16.mxu0 %v5484_v55  ;;  %v5602_v28 = vld [vmem:[#allocation8 + $0x170] ss:$8 sps:$4 sm:$0xff]   ;;  %v5604_v55 = vld [vmem:[#allocation8 + $0x174] ss:$8 sps:$4 sm:$0xff]  }
 0x248   : > { %3313 = vmatprep.subr.bf16.mxu1 %v5487_v57  ;;  %v5568_v57 = vld [vmem:[#allocation8 + $0x34] ss:$8 sps:$4 sm:$0xff]  }
 0x24a   : > { %3271 = vmatpush1.bf16.msra.mxu0 %v5482_v31  ;;  %v5607_v31 = vld [vmem:[#allocation8 + $0x164] ss:$8 sps:$4 sm:$0xff]  }
 0x24b   : > { %3314 = vmatpush1.bf16.msra.mxu1 %v5485_v58  ;;  %3272 = vmatprep.subr.bf16.mxu0 %v5490_v59  ;;  %v5610_v58 = vld [vmem:[#allocation8 + $0x154] ss:$8 sps:$4 sm:$0xff]   ;;  %v5571_v59 = vld [vmem:[#allocation8 + $0x24] ss:$8 sps:$4 sm:$0xff]  }
 0x24c   : > { %3315 = vmatprep.subr.bf16.mxu1 %v5493_v60  ;;  %v5608_v60 = vld [vmem:[#allocation8 + $0x150] ss:$8 sps:$4 sm:$0xff]  }
 0x24e   : > { %3273 = vmatpush1.bf16.msra.mxu0 %v5488_v61  ;;  %v5569_v61 = vld [vmem:[#allocation8 + $0x20] ss:$8 sps:$4 sm:$0xff]  }
 0x24f   : > { %3316 = vmatpush1.bf16.msra.mxu1 %v5491_v62  ;;  %3274 = vmatprep.subr.bf16.mxu0 %v5496_v63  ;;  %v5613_v62 = vld [vmem:[#allocation8 + $0x144] ss:$8 sps:$4 sm:$0xff]   ;;  %v5574_v63 = vld [vmem:[#allocation8 + $0x14] ss:$8 sps:$4 sm:$0xff]  }
 0x250   : > { %3317 = vmatprep.subr.bf16.mxu1 %v5499_v0  ;;  %v5611_v0 = vld [vmem:[#allocation8 + $0x140] ss:$8 sps:$4 sm:$0xff]  }
 0x252   : > { %3275 = vmatpush1.bf16.msra.mxu0 %v5494_v1  ;;  %v5572_v1 = vld [vmem:[#allocation8 + $0x10] ss:$8 sps:$4 sm:$0xff]  }
 0x253   : > { %3318 = vmatpush1.bf16.msra.mxu1 %v5497_v2  ;;  %3276 = vmatprep.subr.bf16.mxu0 %v5502_v3  ;;  %v5616_v2 = vld [vmem:[#allocation8 + $0x134] ss:$8 sps:$4 sm:$0xff]   ;;  %v5577_v3 = vld [vmem:[#allocation8 + $0x4] ss:$8 sps:$4 sm:$0xff]  }
 0x254   : > { %3319 = vmatprep.subr.bf16.mxu1 %v5505_v4  ;;  %v5614_v4 = vld [vmem:[#allocation8 + $0x130] ss:$8 sps:$4 sm:$0xff]  }
 0x256   : > { %3277 = vmatpush1.bf16.msra.mxu0 %v5500_v5  ;;  %v5575_v5 = vld [vmem:[#allocation8] ss:$8 sps:$4 sm:$0xff]  }
 0x257   : > { %3320 = vmatpush1.bf16.msra.mxu1 %v5503_v7  ;;  %3278 = vmatprep.subr.bf16.mxu0 %v5508_v14  ;;  %v5619_v7 = vld [vmem:[#allocation8 + $0x124] ss:$8 sps:$4 sm:$0xff]   ;;  %v5580_v14 = vld [vmem:[#allocation8 + $0xf4] ss:$8 sps:$4 sm:$0xff]  }
 0x258   : > { %3321 = vmatprep.subr.bf16.mxu1 %v5511_v15  ;;  %v5617_v15 = vld [vmem:[#allocation8 + $0x120] ss:$8 sps:$4 sm:$0xff]  }
 0x25a   : > { %3279 = vmatpush2.bf16.msra.mxu0 %v5506_v12  ;;  %v5578_v12 = vld [vmem:[#allocation8 + $0xf0] ss:$8 sps:$4 sm:$0xff]  }
 0x25b   : > { %3322 = vmatpush2.bf16.msra.mxu1 %v5509_v16  ;;  %3280 = vmatprep.subr.bf16.mxu0 %v5514_v17  ;;  %v5622_v16 = vld [vmem:[#allocation8 + $0x114] ss:$8 sps:$4 sm:$0xff]   ;;  %v5583_v17 = vld [vmem:[#allocation8 + $0xe4] ss:$8 sps:$4 sm:$0xff]  }
 0x25c   : > { %3323 = vmatprep.subr.bf16.mxu1 %v5517_v18  ;;  %v5620_v18 = vld [vmem:[#allocation8 + $0x110] ss:$8 sps:$4 sm:$0xff]  }
 0x25e   : > { %3281 = vmatpush2.bf16.msra.mxu0 %v5512_v19  ;;  %v5581_v19 = vld [vmem:[#allocation8 + $0xe0] ss:$8 sps:$4 sm:$0xff]  }
 0x25f   : > { %3324 = vmatpush2.bf16.msra.mxu1 %v5515_v20  ;;  %3282 = vmatprep.subr.bf16.mxu0 %v5520_v21  ;;  %v5625_v20 = vld [vmem:[#allocation8 + $0x104] ss:$8 sps:$4 sm:$0xff]   ;;  %v5586_v21 = vld [vmem:[#allocation8 + $0xd4] ss:$8 sps:$4 sm:$0xff]  }
 0x260   : > { %3325 = vmatprep.subr.bf16.mxu1 %v5523_v22  ;;  %v5623_v22 = vld [vmem:[#allocation8 + $0x100] ss:$8 sps:$4 sm:$0xff]  }
 0x262   : > { %3283 = vmatpush2.bf16.msra.mxu0 %v5518_v6  ;;  %v5584_v6 = vld [vmem:[#allocation8 + $0xd0] ss:$8 sps:$4 sm:$0xff]  }
 0x263   : > { %3326 = vmatpush2.bf16.msra.mxu1 %v5521_v23  ;;  %3284 = vmatprep.subr.bf16.mxu0 %v5526_v24  ;;  %v5628_v23 = vld [vmem:[#allocation8 + $0x1f4] ss:$8 sps:$4 sm:$0xff]   ;;  %v5589_v24 = vld [vmem:[#allocation8 + $0xc4] ss:$8 sps:$4 sm:$0xff]  }
 0x264   : > { %3327 = vmatprep.subr.bf16.mxu1 %v5529_v25  ;;  %v5626_v25 = vld [vmem:[#allocation8 + $0x1f0] ss:$8 sps:$4 sm:$0xff]  }
 0x266   : > { %3285 = vmatpush2.bf16.msra.mxu0 %v5524_v26  ;;  %v5587_v26 = vld [vmem:[#allocation8 + $0xc0] ss:$8 sps:$4 sm:$0xff]  }
 0x267   : > { %3328 = vmatpush2.bf16.msra.mxu1 %v5527_v27  ;;  %3286 = vmatprep.subr.bf16.mxu0 %v5532_v29  ;;  %v5631_v27 = vld [vmem:[#allocation8 + $0x1e4] ss:$8 sps:$4 sm:$0xff]   ;;  %v5592_v29 = vld [vmem:[#allocation8 + $0xb4] ss:$8 sps:$4 sm:$0xff]  }
 0x268   : > { %3329 = vmatprep.subr.bf16.mxu1 %v5535_v32  ;;  %v5629_v32 = vld [vmem:[#allocation8 + $0x1e0] ss:$8 sps:$4 sm:$0xff]  }
 0x26a   : > { %3287 = vmatpush2.bf16.msra.mxu0 %v5530_v34  ;;  %v5590_v34 = vld [vmem:[#allocation8 + $0xb0] ss:$8 sps:$4 sm:$0xff]  }
 0x26b   : > { %3330 = vmatpush2.bf16.msra.mxu1 %v5533_v35  ;;  %3288 = vmatprep.subr.bf16.mxu0 %v5538_v36  ;;  %v5634_v35 = vld [vmem:[#allocation8 + $0x1d4] ss:$8 sps:$4 sm:$0xff]   ;;  %v5595_v36 = vld [vmem:[#allocation8 + $0xa4] ss:$8 sps:$4 sm:$0xff]  }
 0x26c   : > { %3331 = vmatprep.subr.bf16.mxu1 %v5541_v37  ;;  %v5632_v37 = vld [vmem:[#allocation8 + $0x1d0] ss:$8 sps:$4 sm:$0xff]  }
 0x26e   : > { %3289 = vmatpush2.bf16.msra.mxu0 %v5536_v38  ;;  %v5593_v38 = vld [vmem:[#allocation8 + $0xa0] ss:$8 sps:$4 sm:$0xff]  }
 0x26f   : > { %3332 = vmatpush2.bf16.msra.mxu1 %v5539_v39  ;;  %3290 = vmatprep.subr.bf16.mxu0 %v5544_v40  ;;  %v5637_v39 = vld [vmem:[#allocation8 + $0x1c4] ss:$8 sps:$4 sm:$0xff]  }
 0x270   : > { %3333 = vmatprep.subr.bf16.mxu1 %v5547_v41  ;;  %v5598_v41 = vld [vmem:[#allocation8 + $0x94] ss:$8 sps:$4 sm:$0xff]  }
 0x272   : > { %3291 = vmatpush2.bf16.msra.mxu0 %v5542_v44 }
 0x273   : > { %3334 = vmatpush2.bf16.msra.mxu1 %v5545_v45  ;;  %3292 = vmatprep.subr.bf16.mxu0 %v5550_v47  ;;  %v5635_v45 = vld [vmem:[#allocation8 + $0x1c0] ss:$8 sps:$4 sm:$0xff]   ;;  %v5596_v47 = vld [vmem:[#allocation8 + $0x90] ss:$8 sps:$4 sm:$0xff]  }
 0x274   : > { %3335 = vmatprep.subr.bf16.mxu1 %v5553_v56 }
 0x276   : > { %3293 = vmatpush2.bf16.msra.mxu0 %v5548_v48  ;;  %v5601_v48 = vld [vmem:[#allocation8 + $0x84] ss:$8 sps:$4 sm:$0xff]  }
 0x277   : > { %3336 = vmatpush2.bf16.msra.mxu1 %v5551_v49  ;;  %3756 = vmatprep.subr.bf16.mxu0 %v5556_v43  ;;  %v6327_v49 = vld [vmem:[#allocation14 + $0x8] sm:$0xf] }
 0x278   : > { %3799 = vmatprep.subr.bf16.mxu1 %v5604_v55 }
 0x279   : > { %3295 = vmatmul.mubr.bf16.vlgmr.msra.gmra.mxu0 %v6309_v30  ;;  %v5605_v30 = vld [vmem:[#allocation8 + $0x160] ss:$8 sps:$4 sm:$0xff]   ;;  %v3038_v40 = vpop.f32.mrf.mxu0  ;;  %v3081_v44 = vpop.f32.mrf.mxu1 }
 0x27a   : > { %3338 = vmatmul.mubr.bf16.vlgmr.msra.gmra.mxu1 %v6313_v33  ;;  %3757 = vmatpush1.bf16.msra.mxu0 %v5554_v50  ;;  %v5566_v33 = vld [vmem:[#allocation8 + $0x30] ss:$8 sps:$4 sm:$0xff]   ;;  %v1711_v50 = vrot.slane %v6327_v49, %v6268_v9 }
 0x27b   : > { %3758 = vmatprep.subr.bf16.mxu0 %v5559_v51  ;;  %3800 = vmatpush1.bf16.msra.mxu1 %v5602_v28  ;;  %v3040_v56 = vpop.f32.mrf.mxu0  ;;  %v3083_v43 = vpop.f32.mrf.mxu1  ;;  %v5599_v51 = vld [vmem:[#allocation8 + $0x80] ss:$8 sps:$4 sm:$0xff]  }
 0x27c   : > { %3801 = vmatprep.subr.bf16.mxu1 %v5607_v31 }
 0x27e   : > { %3759 = vmatpush1.bf16.msra.mxu0 %v5557_v52  ;;  %v1707_v52 = vrot.slane %v6327_v49, %v6271_v10 }
 0x27f   : > { %3760 = vmatprep.subr.bf16.mxu0 %v5562_v42  ;;  %3802 = vmatpush1.bf16.msra.mxu1 %v5605_v30  ;;  %v3042_v42 = vpop.f32.mrf.mxu0  ;;  %v5640_v30 = vld [vmem:[#allocation8 + $0x1b4] ss:$8 sps:$4 sm:$0xff]  }
 0x280   : > { %3803 = vmatprep.subr.bf16.mxu1 %v5610_v58  ;;  %v3043_v55 = vadd.f32 %v3042_v42, %v1707_v52 }
 0x281   : > { %v3044_v28 = vpop.f32.mrf.mxu0 }
 0x282   : > { %3761 = vmatpush1.bf16.msra.mxu0 %v5560_v53  ;;  %v3085_v53 = vpop.f32.mrf.mxu1  ;;  %v3045_v58 = vadd.f32 %v3044_v28, %v1711_v50 }
 0x283   : > { %3762 = vmatprep.subr.bf16.mxu0 %v5565_v46  ;;  %3804 = vmatpush1.bf16.msra.mxu1 %v5608_v60  ;;  %v3041_v46 = vadd.f32 %v3040_v56, %v1711_v50  ;;  %v5638_v60 = vld [vmem:[#allocation8 + $0x1b0] ss:$8 sps:$4 sm:$0xff]  }
 0x284   : > { %3805 = vmatprep.subr.bf16.mxu1 %v5613_v62 }
 0x286   : > { %3763 = vmatpush1.bf16.msra.mxu0 %v5563_v54  ;;  %v3039_v54 = vadd.f32 %v3038_v40, %v1707_v52  ;;  %v5655_v40 = vld [vmem:[#allocation10 + $0x28] sm:$0xff]   ;;  %v1715_v52 = vrot.slane %v6327_v49, %v570_v13 }
 0x287   : > { %3764 = vmatprep.subr.bf16.mxu0 %v5568_v57  ;;  %3806 = vmatpush1.bf16.msra.mxu1 %v5611_v0  ;;  %v3087_v57 = vpop.f32.mrf.mxu1 }
 0x288   : > { %3807 = vmatprep.subr.bf16.mxu1 %v5616_v2 }
 0x28a   : > { %3765 = vmatpush1.bf16.msra.mxu0 %v5566_v33  ;;  %v3084_v33 = vadd.f32 %v3083_v43, %v3041_v46 }
 0x28b   : > { %3766 = vmatprep.subr.bf16.mxu0 %v5571_v59  ;;  %3808 = vmatpush1.bf16.msra.mxu1 %v5614_v4  ;;  %v5643_v4 = vld [vmem:[#allocation8 + $0x1a4] ss:$8 sps:$4 sm:$0xff]  }
 0x28c   : > { %3809 = vmatprep.subr.bf16.mxu1 %v5619_v7 }
 0x28e   : > { %3767 = vmatpush1.bf16.msra.mxu0 %v5569_v61  ;;  %v3082_v61 = vadd.f32 %v3081_v44, %v3039_v54  ;;  %v5657_v44 = vld [vmem:[#allocation10 + $0x20] sm:$0xff]  }
 0x28f   : > { %3768 = vmatprep.subr.bf16.mxu0 %v5574_v63  ;;  %3810 = vmatpush1.bf16.msra.mxu1 %v5617_v15  ;;  %v3086_v63 = vadd.f32 %v3085_v53, %v3043_v55  ;;  %v5641_v15 = vld [vmem:[#allocation8 + $0x1a0] ss:$8 sps:$4 sm:$0xff]  }
 0x290   : > { %3811 = vmatprep.subr.bf16.mxu1 %v5622_v16 }
 0x292   : > { %3769 = vmatpush1.bf16.msra.mxu0 %v5572_v1 }
 0x293   : > { %3770 = vmatprep.subr.bf16.mxu0 %v5577_v3  ;;  %3812 = vmatpush1.bf16.msra.mxu1 %v5620_v18 }
 0x294   : > { %3813 = vmatprep.subr.bf16.mxu1 %v5625_v20 }
 0x296   : > { %3771 = vmatpush1.bf16.msra.mxu0 %v5575_v5  ;;  %v3088_v5 = vadd.f32 %v3087_v57, %v3045_v58 }
 0x297   : > { %3772 = vmatprep.subr.bf16.mxu0 %v5580_v14  ;;  %3814 = vmatpush1.bf16.msra.mxu1 %v5623_v22 }
 0x298   : > { %3815 = vmatprep.subr.bf16.mxu1 %v5628_v23 }
 0x29a   : > { %3773 = vmatpush2.bf16.msra.mxu0 %v5578_v12 }
 0x29b   : > { %3774 = vmatprep.subr.bf16.mxu0 %v5583_v17  ;;  %3816 = vmatpush2.bf16.msra.mxu1 %v5626_v25 }
 0x29c   : > { %3817 = vmatprep.subr.bf16.mxu1 %v5631_v27  ;;  %v5649_v27 = vld [vmem:[#allocation8 + $0x184] ss:$8 sps:$4 sm:$0xff]  }
 0x29e   : > { %3775 = vmatpush2.bf16.msra.mxu0 %v5581_v19 }
 0x29f   : > { %3776 = vmatprep.subr.bf16.mxu0 %v5586_v21  ;;  %3818 = vmatpush2.bf16.msra.mxu1 %v5629_v32  ;;  %v5646_v21 = vld [vmem:[#allocation8 + $0x194] ss:$8 sps:$4 sm:$0xff]   ;;  %v5647_v32 = vld [vmem:[#allocation8 + $0x180] ss:$8 sps:$4 sm:$0xff]  }
 0x2a0   : > { %3819 = vmatprep.subr.bf16.mxu1 %v5634_v35  ;;  %v5650_v35 = vld [vmem:[#allocation10 + $0x78] sm:$0xff]  }
 0x2a2   : > { %3777 = vmatpush2.bf16.msra.mxu0 %v5584_v6  ;;  %v5644_v6 = vld [vmem:[#allocation8 + $0x190] ss:$8 sps:$4 sm:$0xff]  }
 0x2a3   : > { %3778 = vmatprep.subr.bf16.mxu0 %v5589_v24  ;;  %3820 = vmatpush2.bf16.msra.mxu1 %v5632_v37  ;;  %v5652_v37 = vld [vmem:[#allocation10 + $0x70] sm:$0xff]  }
 0x2a4   : > { %3821 = vmatprep.subr.bf16.mxu1 %v5637_v39  ;;  %v5654_v39 = vld [vmem:[#allocation10 + $0x68] sm:$0xff]  }
 0x2a6   : > { %3779 = vmatpush2.bf16.msra.mxu0 %v5587_v26 }
 0x2a7   : > { %3780 = vmatprep.subr.bf16.mxu0 %v5592_v29  ;;  %3822 = vmatpush2.bf16.msra.mxu1 %v5635_v45  ;;  %v5658_v45 = vld [vmem:[#allocation10 + $0x58] sm:$0xff]  }
 0x2a8   : > { %3823 = vmatprep.subr.bf16.mxu1 %v5640_v30 }
 0x2aa   : > { %3781 = vmatpush2.bf16.msra.mxu0 %v5590_v34 }
 0x2ab   : > { %3782 = vmatprep.subr.bf16.mxu0 %v5595_v36  ;;  %3824 = vmatpush2.bf16.msra.mxu1 %v5638_v60  ;;  %v5651_v36 = vld [vmem:[#allocation10 + $0x38] sm:$0xff]  }
 0x2ac   : > { %3825 = vmatprep.subr.bf16.mxu1 %v5643_v4 }
 0x2ae   : > { %3783 = vmatpush2.bf16.msra.mxu0 %v5593_v38  ;;  %v5653_v38 = vld [vmem:[#allocation10 + $0x30] sm:$0xff]  }
 0x2af   : > { %3784 = vmatprep.subr.bf16.mxu0 %v5598_v41  ;;  %3826 = vmatpush2.bf16.msra.mxu1 %v5641_v15  ;;  %v5656_v41 = vld [vmem:[#allocation10 + $0x60] sm:$0xff]  }
 0x2b0   : > { %3827 = vmatprep.subr.bf16.mxu1 %v5646_v21  ;;  %v5661_v21 = vld [vmem:[#allocation10 + $0x10] sm:$0xff]  }
 0x2b2   : > { %3785 = vmatpush2.bf16.msra.mxu0 %v5596_v47  ;;  %v5659_v47 = vld [vmem:[#allocation10 + $0x18] sm:$0xff]  }
 0x2b3   : > { %3786 = vmatprep.subr.bf16.mxu0 %v5601_v48  ;;  %3828 = vmatpush2.bf16.msra.mxu1 %v5644_v6  ;;  %v5663_v6 = vld [vmem:[#allocation10 + $0x8] sm:$0xff]  }
 0x2b4   : > { %3829 = vmatprep.subr.bf16.mxu1 %v5649_v27  ;;  %v5667_v27 = vld [vmem:[#allocation11 + $0x30] sm:$0xff]  }
 0x2b6   : > { %3787 = vmatpush2.bf16.msra.mxu0 %v5599_v51  ;;  %v1719_v51 = vrot.slane %v6327_v49, %v574_v11 }
 0x2b7   : > { %3830 = vmatpush2.bf16.msra.mxu1 %v5647_v32  ;;  %4958 = vmatprep.subr.bf16.mxu0 %v5650_v35  ;;  %v5669_v32 = vld [vmem:[#allocation11 + $0x20] sm:$0xff]  }
 0x2b9   : > { %v3124_v31 = vpop.f32.mrf.mxu0  ;;  %v3167_v59 = vpop.f32.mrf.mxu1 }
 0x2ba   : > { %v3125_v2 = vadd.f32 %v3124_v31, %v3082_v61 }
 0x2bb   : > { %v3126_v62 = vpop.f32.mrf.mxu0  ;;  %v3169_v1 = vpop.f32.mrf.mxu1 }
 0x2bc   : > { %v3127_v0 = vadd.f32 %v3126_v62, %v3084_v33  ;;  %v3168_v19 = vadd.f32 %v3167_v59, %v3125_v2 }
 0x2bd   : > { %v3128_v3 = vpop.f32.mrf.mxu0  ;;  %v3171_v14 = vpop.f32.mrf.mxu1 }
 0x2be   : > { %v3129_v7 = vadd.f32 %v3128_v3, %v3086_v63  ;;  %v3170_v16 = vadd.f32 %v3169_v1, %v3127_v0  ;;  %v3348_v26 = vmax.f32 %v3168_v19, 0.0 }
 0x2bf   : > { %v3130_v12 = vpop.f32.mrf.mxu0  ;;  %v3173_v20 = vpop.f32.mrf.mxu1 }
 0x2c0   : > { %v3172_v17 = vadd.f32 %v3171_v14, %v3129_v7  ;;  %v3131_v18 = vadd.f32 %v3130_v12, %v3088_v5  ;;  %v3349_v24 = vmax.f32 %v3170_v16, 0.0 }
 0x2c2   : > { %v3174_v22 = vadd.f32 %v3173_v20, %v3131_v18  ;;  %v3352_v23 = vmax.f32 %v3172_v17, 0.0  ;;  %v5660_v20 = vld [vmem:[#allocation10 + $0x50] sm:$0xff]  }
 0x2c4   : > { %v3353_v25 = vmax.f32 %v3174_v22, 0.0  ;;  %v3356_v34 = vpack.c.bf16 %v3352_v23, %v3348_v26  ;;  %v5662_v22 = vld [vmem:[#allocation10 + $0x48] sm:$0xff]   ;;  %v5664_v23 = vld [vmem:[#allocation10 + $0x40] sm:$0xff]   ;;  %v5998_v26 = vmov 0.0  }
 0x2c5   : > { %4998 = vmatprep.subr.bf16.mxu1 %v5998_v26 }
 0x2c6   : > { %v3357_v29 = vpack.c.bf16 %v3353_v25, %v3349_v24  ;;  %v5665_v24 = vld [vmem:[#allocation10] sm:$0xff]   ;;  %v5666_v25 = vld [vmem:[#allocation11 + $0x38] sm:$0xff]  }
 0x2c8   : > { %3788 = vmatprep.mubr.bf16.mxu0 %v3357_v29  ;;  %v5668_v29 = vld [vmem:[#allocation11 + $0x28] sm:$0xff]  }
 0x2c9   : > { %3789 = vmatmul.mubr.bf16.vlgmr.msra.gmra.mxu0 %v3356_v34 }
 0x2ca   : > { %4959 = vmatpush3.bf16.msra.mxu0 %v5651_v36  ;;  %v3424_v36 = vld [vmem:[#allocation14 + $0xc] sm:$0x3] }
 0x2cb   : > { %4960 = vmatprep.subr.bf16.mxu0 %v5652_v37 }
 0x2ce   : > { %4961 = vmatpush3.bf16.msra.mxu0 %v5653_v38  ;;  %v3433_v38 = vrot.slane %v3424_v36, %v6268_v9 }
 0x2cf   : > { %4962 = vmatprep.subr.bf16.mxu0 %v5654_v39  ;;  %v3429_v39 = vrot.slane %v3424_v36, %v6271_v10  ;;  %v5670_v10 = vld [vmem:[#allocation11 + $0x18] sm:$0xff]  }
 0x2d2   : > { %4963 = vmatpush3.bf16.msra.mxu0 %v5655_v40 }
 0x2d3   : > { %4964 = vmatprep.subr.bf16.mxu0 %v5656_v41 }
 0x2d6   : > { %4965 = vmatpush3.bf16.msra.mxu0 %v5657_v44 }
 0x2d7   : > { %4966 = vmatprep.subr.bf16.mxu0 %v5658_v45 }
 0x2da   : > { %4967 = vmatpush3.bf16.msra.mxu0 %v5659_v47 }
 0x2db   : > { %4968 = vmatprep.subr.bf16.mxu0 %v5660_v20 }
 0x2de   : > { %4969 = vmatpush3.bf16.msra.mxu0 %v5661_v21 }
 0x2df   : > { %4970 = vmatprep.subr.bf16.mxu0 %v5662_v22 }
 0x2e2   : > { %4971 = vmatpush3.bf16.msra.mxu0 %v5663_v6 }
 0x2e3   : > { %4972 = vmatprep.subr.bf16.mxu0 %v5664_v23 }
 0x2e6   : > { %4973 = vmatpush3.bf16.msra.mxu0 %v5665_v24 }
 0x2e7   : > { %5018 = vmatprep.subr.bf16.mxu0 %v5998_v26 }
 0x2f9   : > { %v3210_v56 = vpop.f32.mrf.mxu0  ;;  %v3253_v48 = vpop.f32.mrf.mxu1 }
 0x2fa   : > { %v3211_v54 = vadd.f32 %v3210_v56, %v1715_v52 }
 0x2fb   : > { %v3212_v43 = vpop.f32.mrf.mxu0  ;;  %v3255_v50 = vpop.f32.mrf.mxu1 }
 0x2fc   : > { %v3213_v46 = vadd.f32 %v3212_v43, %v1719_v51  ;;  %v3254_v59 = vadd.f32 %v3253_v48, %v3211_v54 }
 0x2fd   : > { %v3214_v42 = vpop.f32.mrf.mxu0  ;;  %v3257_v53 = vpop.f32.mrf.mxu1 }
 0x2fe   : > { %v3215_v55 = vadd.f32 %v3214_v42, %v1715_v52  ;;  %v3256_v30 = vadd.f32 %v3255_v50, %v3213_v46 }
 0x2ff   : > { %v3216_v28 = vpop.f32.mrf.mxu0  ;;  %v3259_v57 = vpop.f32.mrf.mxu1 }
 0x300   : > { %v3217_v33 = vadd.f32 %v3216_v28, %v1719_v51  ;;  %v3258_v61 = vadd.f32 %v3257_v53, %v3215_v55 }
 0x302   : > { %v3260_v0 = vadd.f32 %v3259_v57, %v3217_v33  ;;  %v5673_v33 = vld [vmem:[#allocation11] sm:$0xff]  }
 0x339   : > { %v3296_v31 = vpop.f32.mrf.mxu0 }
 0x33a   : > { %v3339_v58 = vpop.f32.mrf.mxu1  ;;  %v3297_v63 = vadd.f32 %v3296_v31, %v3254_v59  ;;  %v5671_v31 = vld [vmem:[#allocation11 + $0x10] sm:$0xff]  }
 0x33b   : > { %v3298_v60 = vpop.f32.mrf.mxu0  ;;  %v5675_v59 = vld [vmem:[#allocation13 + $0x30] sm:$0xff]  }
 0x33c   : > { %v3299_v62 = vadd.f32 %v3298_v60, %v3256_v30  ;;  %v3341_v11 = vpop.f32.mrf.mxu1  ;;  %v3340_v5 = vadd.f32 %v3339_v58, %v3297_v63  ;;  %v5672_v30 = vld [vmem:[#allocation11 + $0x8] sm:$0xff]   ;;  %v5674_v58 = vld [vmem:[#allocation13 + $0x38] sm:$0xff]  }
 0x33d   : > { %v3300_v8 = vpop.f32.mrf.mxu0  ;;  %v5676_v60 = vld [vmem:[#allocation13 + $0x28] sm:$0xff]  }
 0x33e   : > { %v3301_v13 = vadd.f32 %v3300_v8, %v3258_v61  ;;  %v3343_v49 = vpop.f32.mrf.mxu1  ;;  %v3342_v2 = vadd.f32 %v3341_v11, %v3299_v62  ;;  %v3350_v17 = vmax.f32 %v3340_v5, 0.0  ;;  %v5677_v61 = vld [vmem:[#allocation13 + $0x20] sm:$0xff]   ;;  %v5678_v62 = vld [vmem:[#allocation13 + $0x18] sm:$0xff]  }
 0x33f   : > { %v3302_v1 = vpop.f32.mrf.mxu0 }
 0x340   : > { %v3344_v3 = vadd.f32 %v3343_v49, %v3301_v13  ;;  %v3303_v4 = vadd.f32 %v3302_v1, %v3260_v0  ;;  %v3345_v7 = vpop.f32.mrf.mxu1  ;;  %v3351_v12 = vmax.f32 %v3342_v2, 0.0  ;;  %v4904_v0 = vld [vmem:[#allocation14 + $0xe] ss:$0 sm:$0xff] }
 0x342   : > { %v3346_v14 = vadd.f32 %v3345_v7, %v3303_v4  ;;  %v3354_v15 = vmax.f32 %v3344_v3, 0.0 }
 0x344   : > { %v3355_v16 = vmax.f32 %v3346_v14, 0.0  ;;  %v3358_v19 = vpack.c.bf16 %v3354_v15, %v3350_v17  ;;  %v5679_v14 = vld [vmem:[#allocation13 + $0x10] sm:$0xff]   ;;  %v5680_v15 = vld [vmem:[#allocation13 + $0x8] sm:$0xff]  }
 0x346   : > { %v3359_v18 = vpack.c.bf16 %v3355_v16, %v3351_v12  ;;  %v5681_v12 = vld [vmem:[#allocation13] sm:$0xff]   ;;  %v4921_v16 = vld [vmem:[#allocation14 + $0xf] ss:$0 sm:$0xff] }
 0x348   : > { %3831 = vmatprep.mubr.bf16.mxu1 %v3359_v18 }
 0x349   : > { %3832 = vmatmul.mubr.bf16.vlgmr.msra.gmra.mxu1 %v3358_v19 }
 0x34a   : > { %4999 = vmatpush3.bf16.msra.mxu1 %v5666_v25  ;;  %5014 = vmatprep.mubr.msk.bf16.mxu1 %vm5999_vm0, %v5998_v26  ;;  %v4930_v25 = vld [vmem:[#allocation14 + $0x10] ss:$0 sm:$0xff] }
 0x34b   : > { %5000 = vmatprep.subr.bf16.mxu1 %v5998_v26 }
 0x34e   : > { %5001 = vmatpush3.bf16.msra.mxu1 %v5667_v27 }
 0x34f   : > { %5002 = vmatprep.subr.bf16.mxu1 %v5998_v26 }
 0x352   : > { %5003 = vmatpush3.bf16.msra.mxu1 %v5668_v29 }
 0x353   : > { %5004 = vmatprep.subr.bf16.mxu1 %v5998_v26 }
 0x356   : > { %5005 = vmatpush3.bf16.msra.mxu1 %v5669_v32 }
 0x357   : > { %5006 = vmatprep.subr.bf16.mxu1 %v5998_v26 }
 0x35a   : > { %5007 = vmatpush3.bf16.msra.mxu1 %v5670_v10 }
 0x35b   : > { %5008 = vmatprep.subr.bf16.mxu1 %v5998_v26 }
 0x35e   : > { %5009 = vmatpush3.bf16.msra.mxu1 %v5671_v31 }
 0x35f   : > { %5010 = vmatprep.subr.bf16.mxu1 %v5998_v26 }
 0x362   : > { %5011 = vmatpush3.bf16.msra.mxu1 %v5672_v30 }
 0x363   : > { %5012 = vmatprep.subr.bf16.mxu1 %v5998_v26 }
 0x366   : > { %5013 = vmatpush3.bf16.msra.mxu1 %v5673_v33 }
 0x389   : > { %v3790_v34 = vpop.f32.mrf.mxu0 }
 0x38a   : > { %v3791_v56 = vadd.f32 %v3790_v34, %v3429_v39 }
 0x38b   : > { %v3792_v35 = vpop.f32.mrf.mxu0 }
 0x38c   : > { %v3793_v45 = vadd.f32 %v3792_v35, %v3433_v38 }
 0x38d   : > { %v3794_v37 = vpop.f32.mrf.mxu0 }
 0x38e   : > { %v3795_v47 = vadd.f32 %v3794_v37, %v3429_v39 }
 0x38f   : > { %v3796_v41 = vpop.f32.mrf.mxu0 }
 0x390   : > { %v3797_v43 = vadd.f32 %v3796_v41, %v3433_v38 }
 0x409   : > { %v3833_v40 = vpop.f32.mrf.mxu1 }
 0x40a   : > { %v3834_v52 = vadd.f32 %v3833_v40, %v3791_v56 }
 0x40b   : > { %v3835_v44 = vpop.f32.mrf.mxu1 }
 0x40c   : > { %v3836_v50 = vadd.f32 %v3835_v44, %v3793_v45  ;;  %v3842_v55 = vmax.f32 %v3834_v52, 0.0 }
 0x40d   : > { %v3837_v48 = vpop.f32.mrf.mxu1 }
 0x40e   : > { %v3838_v51 = vadd.f32 %v3837_v48, %v3795_v47  ;;  %v3843_v54 = vmax.f32 %v3836_v50, 0.0 }
 0x40f   : > { %v3839_v42 = vpop.f32.mrf.mxu1 }
 0x410   : > { %v3840_v53 = vadd.f32 %v3839_v42, %v3797_v43  ;;  %v3844_v46 = vmax.f32 %v3838_v51, 0.0 }
 0x412   : > { %v3845_v28 = vmax.f32 %v3840_v53, 0.0  ;;  %v3846_v57 = vpack.c.bf16 %v3844_v46, %v3842_v55 }
 0x414   : > { %v3847_v9 = vpack.c.bf16 %v3845_v28, %v3843_v54 }
 0x416   : > { %4015 = vmatprep.mubr.bf16.mxu0 %v3847_v9 }
 0x417   : > { %4016 = vmatmul.mubr.bf16.vlgmr.msra.gmra.mxu0 %v3846_v57 }
 0x418   : > { %5034 = vmatprep.mubr.msk.bf16.mxu0 %vm5999_vm0, %v5998_v26  ;;  %5019 = vmatpush3.bf16.msra.mxu0 %v5674_v58 }
 0x419   : > { %5020 = vmatprep.subr.bf16.mxu0 %v5998_v26 }
 0x41c   : > { %5021 = vmatpush3.bf16.msra.mxu0 %v5675_v59 }
 0x41d   : > { %5022 = vmatprep.subr.bf16.mxu0 %v5998_v26 }
 0x420   : > { %5023 = vmatpush3.bf16.msra.mxu0 %v5676_v60 }
 0x421   : > { %5024 = vmatprep.subr.bf16.mxu0 %v5998_v26 }
 0x424   : > { %5025 = vmatpush3.bf16.msra.mxu0 %v5677_v61 }
 0x425   : > { %5026 = vmatprep.subr.bf16.mxu0 %v5998_v26 }
 0x428   : > { %5027 = vmatpush3.bf16.msra.mxu0 %v5678_v62 }
 0x429   : > { %5028 = vmatprep.subr.bf16.mxu0 %v5998_v26 }
 0x42c   : > { %5029 = vmatpush3.bf16.msra.mxu0 %v5679_v14 }
 0x42d   : > { %5030 = vmatprep.subr.bf16.mxu0 %v5998_v26 }
 0x430   : > { %5031 = vmatpush3.bf16.msra.mxu0 %v5680_v15 }
 0x431   : > { %5032 = vmatprep.subr.bf16.mxu0 %v5998_v26 }
 0x434   : > { %5033 = vmatpush3.bf16.msra.mxu0 %v5681_v12 }
 0x4d7   : > { %v4974_v11 = vpop.f32.mrf.mxu0 }
 0x4d9   : > { %v4975_v63 = vpop.f32.mrf.mxu0 }
 0x4da   : > { %v4976_v8 = vadd.f32 %v4975_v63, %v4974_v11 }
 0x4db   : > { %v4977_v13 = vpop.f32.mrf.mxu0 }
 0x4dc   : > { %v4018_v1 = vadd.f32 %v4976_v8, %v4904_v0 }
 0x4dd   : > { %v4978_v49 = vpop.f32.mrf.mxu0 }
 0x4de   : > { %v4979_v2 = vadd.f32 %v4978_v49, %v4977_v13  ;;  %v4024_v4 = vmax.f32 %v4018_v1, 0.0 }
 0x4e0   : > { %v4021_v3 = vadd.f32 %v4979_v2, %v4904_v0 }
 0x4e2   : > { %v4025_v5 = vmax.f32 %v4021_v3, 0.0 }
 0x4e4   : > { %v4026_v7 = vpack.c.bf16 %v4025_v5, %v4024_v4 }
 0x4e6   : > { %5015 = vmatmul.mubr.bf16.vlgmr.msra.gmra.mxu1 %v4026_v7 }
 0x5a6   : > { %v4132_v17 = vpop.f32.mrf.mxu1 }
 0x5a7   : > { %v4133_v19 = vadd.f32 %v4921_v16, %v4132_v17 }
 0x5a8   : > { %v5016_v18 = vpop.f32.mrf.mxu1 }
 0x5a9   : > { %v4139_v6 = vmax.f32 %v4133_v19, 0.0 }
 0x5aa   : > { %v4135_v20 = vpop.f32.mrf.mxu1 }
 0x5ab   : > { %v4136_v21 = vadd.f32 %v4921_v16, %v4135_v20 }
 0x5ac   : > { %v5017_v22 = vpop.f32.mrf.mxu1 }
 0x5ad   : > { %v4140_v23 = vmax.f32 %v4136_v21, 0.0 }
 0x5af   : > { %v4141_v24 = vpack.c.bf16 %v4140_v23, %v4139_v6 }
 0x5b1   : > { %5035 = vmatmul.mubr.bf16.vlgmr.msra.gmra.mxu0 %v4141_v24 }
 0x671   : > { %v4247_v27 = vpop.f32.mrf.mxu0 }
 0x672   : > { %v4248_v29 = vadd.f32 %v4930_v25, %v4247_v27 }
 0x673   : > { %v5036_v32 = vpop.f32.mrf.mxu0 }
 0x674   : > { %v4939_v26 = vmul.f32 -1.442695, %v4248_v29 }
 0x675   : > { %v4250_v34 = vpop.f32.mrf.mxu0 }
 0x676   : > { %5682 = vpow2.f32 %v4939_v26  ;;  %v4251_v35 = vadd.f32 %v4930_v25, %v4250_v34 }
 0x677   : > { %v5037_v36 = vpop.f32.mrf.mxu0 }
 0x678   : > { %v4940_v37 = vmul.f32 -1.442695, %v4251_v35 }
 0x67a   : > { %5684 = vpow2.f32 %v4940_v37 }
 0x683   : > { %v5683_v38 = vpop.eup %5682 }
 0x684   : > { %v4260_v39 = vadd.f32 1.0, %v5683_v38 }
 0x686   : > { %5686 = vrcp.f32 %v4260_v39 }
 0x687   : > { %v5685_v40 = vpop.eup %5684 }
 0x688   : > { %v4261_v41 = vadd.f32 1.0, %v5685_v40 }
 0x68a   : > { %5688 = vrcp.f32 %v4261_v41 }
 0x693   : > { %v5687_v44 = vpop.eup %5686 }
 0x697   : > { %v5689_v45 = vpop.eup %5688 }
 0x698   : > { %v4956_v47 = vpack.c.bf16 %v5689_v45, %v5687_v44 }
 0x69a   : > { %4957 = vst [vmem:[%s424_s20] sm:$0xff] %v4956_v47  }
 0x69b   : > { %5913 = shalt.err (!%p5910_p6)
}
 0x69c   : > { %s5914_s2 = scalar_lea.hbm %s6364_s17, 128  ;;  %s5918_s12 = scalar_lea.hbm %s6417_s8, 256 }
 0x69d   : > { %p5915_p4 = scmp.ne.s32.totalorder %s6364_s17, %s5914_s2  ;;  %p5919_p0 = scmp.lt.s32.totalorder %s6364_s17, %s6417_s8 }
 0x69e   : > { %p5920_p2 = scmp.lt.s32.totalorder %s5918_s12, %s5914_s2 }
 0x69f   : > { %p5916_p10 = pnand %p5915_p4, %p6448_p11 }
 0x6a0   : > { %p5921_p5 = por %p5920_p2, %p5919_p0 }
 0x6a1   : > { %p5917_p13 = pneg %p5916_p10 }
 0x6a3   : > { %p5922_p9 = pnand %p5921_p5, %p5917_p13 }
 0x6a5   : > { %5925 = shalt.err (!%p5922_p9)
}
 0x6a6   : > { %s6001_s16 = smov 64   ;;  %s6002_s14 = smov 4  }
 0x6a7   : > { %5068 = dma.vmem_to_hbm [thread:$0]  (%p6448_p11), %s6366_s19, 128, %s6364_s17, %s4277_s23, %s6001_s16, %s6001_s16, %s6002_s14  }
 0x6a8 PF: > { %s4305_s13 = sand.u32 1, %s5968_s27   ;;  %p6449_p7 = scmp.ne.s32.totalorder %s6434_s26, 0 }
 0x6a9   : > { %p6450_p12 = scmp.ge.s32.totalorder %s5980_s30, 2  ;;  %s4306_s11 = scalar_lea.sflag [#allocation4], %s4305_s13 }
 0x6ab   : > { %p5097_p1 = pnand %p6450_p12, %p6449_p7 }
 0x6ad   : > { %p5098_p3 = pneg %p5097_p1 }
 0x6af   : > { %5963 = dma.done.wait (%p5098_p3), %s4306_s11, 128  }
 0x6b0   : > { %5965 = vsyncadd (%p5098_p3), %s4306_s11, 4294967168  ;;  %p25_p8 = scmp.ge.s32.totalorder %s6156_s15, 4   ;;  %s6451_s27 = smov %s5972_s28 }
 0x6b1   : > { %s6452_s28 = smov %s5976_s29  ;;  %s6453_s29 = smov %s6168_s21 }
 0x6b2   : > { %s6454_s30 = smov %s6156_s15  ;;  %27 = sbr.rel (!%p25_p8) target bundleno = 12 (0xc), region = 125 }
 0x6b7   :  { %4311 = vsyncpa [#allocation3], 1 }
 0x6b8   :  { %4313 = vsyncpa [#allocation3 + $0x1], 1 }
 0x6b9   :  { %4314 = vsyncpa [#allocation6], 1 }
 0x6ba   :  { %4315 = vsyncpa [#allocation9], 1 }
 0x6bb   :  { %4316 = vsyncpa [#allocation12], 1 }
 0x6bc   :  { %4317 = vsyncpa [#allocation15], 1 }
 0x6bd   :  { %4318 = vsyncpa [#allocation4], 1 }
 0x6be   :  { %4320 = vsyncpa [#allocation4 + $0x1], 1 }

</bundles_post_ra>
